<compile_context>
chip_gen: v6e
topology: v6e:2x2x1
jax: 0.10.0
libtpu: 0.0.40
codegen_flags: <defaults>
</compile_context>

<pallas_src>
import functools

import jax
import jax.numpy as jnp
from jax.experimental import pallas as pl
from jax.experimental.pallas import tpu as pltpu

LATENT_DIM = 32
HIDDEN1 = 128
HIDDEN2 = 512
OUTPUT_DIM = 1024


def _round_up(x, m):
    return ((x + m - 1) // m) * m


def fc_decoder_kernel(z_ref, w1_ref, b1_ref, w2_ref, b2_ref, w3_ref, b3_ref, o_ref):
    # z arrives f32; cast to bf16 in-kernel (tiny VPU op, hidden under weight/output DMA).
    z = z_ref[...].astype(jnp.bfloat16)
    h1 = jnp.dot(z, w1_ref[...], preferred_element_type=jnp.float32) + b1_ref[...]
    h1 = jnp.maximum(h1, 0.0).astype(jnp.bfloat16)
    h2 = jnp.dot(h1, w2_ref[...], preferred_element_type=jnp.float32) + b2_ref[...]
    h2 = jnp.maximum(h2, 0.0).astype(jnp.bfloat16)
    out = jnp.dot(h2, w3_ref[...], preferred_element_type=jnp.float32) + b3_ref[...]
    o_ref[...] = out.astype(o_ref.dtype)


def prepare_params(params):
    """One-time prep (call OUTSIDE the hot loop): weights -> bf16, biases stay f32 (1, out)."""
    w1, b1, w2, b2, w3, b3 = params
    return (
        w1.astype(jnp.bfloat16), b1.astype(jnp.float32),
        w2.astype(jnp.bfloat16), b2.astype(jnp.float32),
        w3.astype(jnp.bfloat16), b3.astype(jnp.float32),
    )


@functools.partial(jax.jit, static_argnames=("block_b", "out_dtype"))
def fc_decoder(z, params, *, block_b=512, out_dtype=jnp.float32):
    """z: (B, LATENT_DIM) f32.  params: prepare_params() output — w_i (in,out) bf16, b_i (1,out) f32."""
    w1, b1, w2, b2, w3, b3 = params
    B = z.shape[0]

    # Batch tile: multiple of 8 (sublane); sized to B when it fits under the cap (zero padding),
    # else capped at block_b (512 default stays inside v5e's 16 MiB scoped VMEM).
    tb = min(block_b, _round_up(B, 8))
    b_pad = _round_up(B, tb)
    z_p = z if b_pad == B else jnp.pad(z, ((0, b_pad - B), (0, 0)))

    grid = (b_pad // tb,)

    # Grid-invariant weights/biases: single-buffered, VMEM-resident across all batch tiles.
    def weight_spec(shape):
        return pl.BlockSpec(shape, lambda i: (0, 0), pipeline_mode=pl.Buffered(1))

    out_itemsize = jnp.dtype(out_dtype).itemsize
    flops = 2 * b_pad * (LATENT_DIM * HIDDEN1 + HIDDEN1 * HIDDEN2 + HIDDEN2 * OUTPUT_DIM)
    bytes_accessed = (
        2 * (LATENT_DIM * HIDDEN1 + HIDDEN1 * HIDDEN2 + HIDDEN2 * OUTPUT_DIM)   # bf16 weights
        + 4 * (HIDDEN1 + HIDDEN2 + OUTPUT_DIM)                                   # f32 biases
        + 4 * b_pad * LATENT_DIM                                                 # f32 z
        + out_itemsize * b_pad * OUTPUT_DIM                                      # output
    )

    out = pl.pallas_call(
        fc_decoder_kernel,
        out_shape=jax.ShapeDtypeStruct((b_pad, OUTPUT_DIM), out_dtype),
        grid=grid,
        in_specs=[
            pl.BlockSpec((tb, LATENT_DIM), lambda i: (i, 0)),
            weight_spec((LATENT_DIM, HIDDEN1)),
            weight_spec((1, HIDDEN1)),
            weight_spec((HIDDEN1, HIDDEN2)),
            weight_spec((1, HIDDEN2)),
            weight_spec((HIDDEN2, OUTPUT_DIM)),
            weight_spec((1, OUTPUT_DIM)),
        ],
        out_specs=pl.BlockSpec((tb, OUTPUT_DIM), lambda i: (i, 0)),
        compiler_params=pltpu.CompilerParams(
            dimension_semantics=("parallel",),
            vmem_limit_bytes=32 * 1024 * 1024,
        ),
        cost_estimate=pl.CostEstimate(
            flops=flops, transcendentals=0, bytes_accessed=bytes_accessed
        ),
    )(z_p, w1, b1, w2, b2, w3, b3)

    return out[:B]


def init_params(key):
    # Deterministic init mirroring nn.Linear's uniform(-1/sqrt(fan_in), 1/sqrt(fan_in)).
    def linear_init(k, fan_in, fan_out):
        kw, kb = jax.random.split(k)
        bound = 1.0 / jnp.sqrt(fan_in)
        w = jax.random.uniform(kw, (fan_in, fan_out), jnp.float32, -bound, bound)
        b = jax.random.uniform(kb, (1, fan_out), jnp.float32, -bound, bound)
        return w, b

    k1, k2, k3 = jax.random.split(key, 3)
    w1, b1 = linear_init(k1, LATENT_DIM, HIDDEN1)
    w2, b2 = linear_init(k2, HIDDEN1, HIDDEN2)
    w3, b3 = linear_init(k3, HIDDEN2, OUTPUT_DIM)
    return w1, b1, w2, b2, w3, b3


def fc_decoder_ref_f32(z, params_f32):
    w1, b1, w2, b2, w3, b3 = params_f32
    h1 = jnp.maximum(z @ w1 + b1, 0.0)
    h2 = jnp.maximum(h1 @ w2 + b2, 0.0)
    return h2 @ w3 + b3


def fc_decoder_ref_bf16(z, params_f32):
    # Mirrors the kernel's bf16-weight / f32-accumulation path for a tight comparison.
    w1, b1, w2, b2, w3, b3 = params_f32
    zb = z.astype(jnp.bfloat16)
    h1 = jnp.dot(zb, w1.astype(jnp.bfloat16), preferred_element_type=jnp.float32) + b1
    h1 = jnp.maximum(h1, 0.0).astype(jnp.bfloat16)
    h2 = jnp.dot(h1, w2.astype(jnp.bfloat16), preferred_element_type=jnp.float32) + b2
    h2 = jnp.maximum(h2, 0.0).astype(jnp.bfloat16)
    return jnp.dot(h2, w3.astype(jnp.bfloat16), preferred_element_type=jnp.float32) + b3


if __name__ == "__main__":
    key = jax.random.PRNGKey(0)
    k_params, k_z1, k_z2 = jax.random.split(key, 3)
    params_f32 = init_params(k_params)
    params = prepare_params(params_f32)  # one-time bf16 cast, outside the hot path

    # Small batch (sub-tile, padded internally to an 8-row multiple).
    B1 = 2
    z1 = jax.random.normal(k_z1, (B1, LATENT_DIM), jnp.float32)
    out1 = jax.block_until_ready(fc_decoder(z1, params))
    assert out1.shape == (B1, OUTPUT_DIM)
    assert out1.dtype == jnp.float32
    assert jnp.allclose(out1, fc_decoder_ref_bf16(z1, params_f32), atol=1e-2, rtol=1e-2)
    assert jnp.allclose(out1, fc_decoder_ref_f32(z1, params_f32), atol=5e-2, rtol=5e-2)

    # Non-multiple-of-8 batch: default tile picks tb=208 (zero padded rows); a small block_b
    # exercises the multi-tile grid path + VMEM-resident single-buffered weights.
    B2 = 200
    z2 = jax.random.normal(k_z2, (B2, LATENT_DIM), jnp.float32)
    out2 = jax.block_until_ready(fc_decoder(z2, params))
    out2_tiled = jax.block_until_ready(fc_decoder(z2, params, block_b=64))
    assert out2.shape == (B2, OUTPUT_DIM)
    assert jnp.allclose(out2, fc_decoder_ref_bf16(z2, params_f32), atol=1e-2, rtol=1e-2)
    assert jnp.allclose(out2, fc_decoder_ref_f32(z2, params_f32), atol=5e-2, rtol=5e-2)
    assert jnp.allclose(out2_tiled, out2, atol=1e-5, rtol=1e-5)

    print("KERNEL_OK")
</pallas_src>

<mosaic_0001>
module attributes {stable_mosaic.version = 11 : i64} {
  func.func @fc_decoder_kernel(%arg0: i32, %arg1: memref<8x32xf32, #tpu.memory_space<vmem>>, %arg2: memref<32x128xbf16, #tpu.memory_space<vmem>>, %arg3: memref<1x128xf32, #tpu.memory_space<vmem>>, %arg4: memref<128x512xbf16, #tpu.memory_space<vmem>>, %arg5: memref<1x512xf32, #tpu.memory_space<vmem>>, %arg6: memref<512x1024xbf16, #tpu.memory_space<vmem>>, %arg7: memref<1x1024xf32, #tpu.memory_space<vmem>>, %arg8: memref<8x1024xf32, #tpu.memory_space<vmem>>) attributes {dimension_semantics = [#tpu.dimension_semantics<parallel>], iteration_bounds = array<i64: 1>, scalar_prefetch = 0 : i64, scratch_operands = 0 : i64, tpu.core_type = #tpu.core_type<tc>, window_params = [{transform_indices = @transform_0, window_bounds = array<i64: 8, 32>}, {pipeline_mode = #tpu.pipeline_mode<synchronous>, transform_indices = @transform_1, window_bounds = array<i64: 32, 128>}, {pipeline_mode = #tpu.pipeline_mode<synchronous>, transform_indices = @transform_2, window_bounds = array<i64: 1, 128>}, {pipeline_mode = #tpu.pipeline_mode<synchronous>, transform_indices = @transform_3, window_bounds = array<i64: 128, 512>}, {pipeline_mode = #tpu.pipeline_mode<synchronous>, transform_indices = @transform_4, window_bounds = array<i64: 1, 512>}, {pipeline_mode = #tpu.pipeline_mode<synchronous>, transform_indices = @transform_5, window_bounds = array<i64: 512, 1024>}, {pipeline_mode = #tpu.pipeline_mode<synchronous>, transform_indices = @transform_6, window_bounds = array<i64: 1, 1024>}, {transform_indices = @transform_7, window_bounds = array<i64: 8, 1024>}]} {
    %c0 = arith.constant 0 : index
    %c0_0 = arith.constant 0 : index
    %0 = vector.load %arg1[%c0, %c0_0] : memref<8x32xf32, #tpu.memory_space<vmem>>, vector<8x32xf32>
    %1 = arith.truncf %0 : vector<8x32xf32> to vector<8x32xbf16>
    %c0_1 = arith.constant 0 : index
    %c0_2 = arith.constant 0 : index
    %2 = vector.load %arg2[%c0_1, %c0_2] : memref<32x128xbf16, #tpu.memory_space<vmem>>, vector<32x128xbf16>
    %cst = arith.constant dense<0.000000e+00> : vector<8x128xf32>
    %3 = tpu.matmul %1, %2, %cst {dimension_numbers = #tpu.dot_dimension_numbers<[1], [0], [0], [1], [0, 0, 1, 1], [], []>} : vector<8x32xbf16>, vector<32x128xbf16>, vector<8x128xf32> -> vector<8x128xf32>
    %c0_3 = arith.constant 0 : index
    %c0_4 = arith.constant 0 : index
    %4 = vector.load %arg3[%c0_3, %c0_4] : memref<1x128xf32, #tpu.memory_space<vmem>>, vector<1x128xf32>
    %5 = vector.broadcast %4 : vector<1x128xf32> to vector<8x128xf32>
    %6 = arith.addf %3, %5 : vector<8x128xf32>
    %cst_5 = arith.constant 0.000000e+00 : f32
    %7 = vector.broadcast %cst_5 : f32 to vector<8x128xf32>
    %8 = arith.maximumf %6, %7 : vector<8x128xf32>
    %9 = arith.truncf %8 : vector<8x128xf32> to vector<8x128xbf16>
    %c0_6 = arith.constant 0 : index
    %c0_7 = arith.constant 0 : index
    %10 = vector.load %arg4[%c0_6, %c0_7] : memref<128x512xbf16, #tpu.memory_space<vmem>>, vector<128x512xbf16>
    %cst_8 = arith.constant dense<0.000000e+00> : vector<8x512xf32>
    %11 = tpu.matmul %9, %10, %cst_8 {dimension_numbers = #tpu.dot_dimension_numbers<[1], [0], [0], [1], [0, 0, 1, 1], [], []>} : vector<8x128xbf16>, vector<128x512xbf16>, vector<8x512xf32> -> vector<8x512xf32>
    %c0_9 = arith.constant 0 : index
    %c0_10 = arith.constant 0 : index
    %12 = vector.load %arg5[%c0_9, %c0_10] : memref<1x512xf32, #tpu.memory_space<vmem>>, vector<1x512xf32>
    %13 = vector.broadcast %12 : vector<1x512xf32> to vector<8x512xf32>
    %14 = arith.addf %11, %13 : vector<8x512xf32>
    %cst_11 = arith.constant 0.000000e+00 : f32
    %15 = vector.broadcast %cst_11 : f32 to vector<8x512xf32>
    %16 = arith.maximumf %14, %15 : vector<8x512xf32>
    %17 = arith.truncf %16 : vector<8x512xf32> to vector<8x512xbf16>
    %c0_12 = arith.constant 0 : index
    %c0_13 = arith.constant 0 : index
    %18 = vector.load %arg6[%c0_12, %c0_13] : memref<512x1024xbf16, #tpu.memory_space<vmem>>, vector<512x1024xbf16>
    %cst_14 = arith.constant dense<0.000000e+00> : vector<8x1024xf32>
    %19 = tpu.matmul %17, %18, %cst_14 {dimension_numbers = #tpu.dot_dimension_numbers<[1], [0], [0], [1], [0, 0, 1, 1], [], []>} : vector<8x512xbf16>, vector<512x1024xbf16>, vector<8x1024xf32> -> vector<8x1024xf32>
    %c0_15 = arith.constant 0 : index
    %c0_16 = arith.constant 0 : index
    %20 = vector.load %arg7[%c0_15, %c0_16] : memref<1x1024xf32, #tpu.memory_space<vmem>>, vector<1x1024xf32>
    %21 = vector.broadcast %20 : vector<1x1024xf32> to vector<8x1024xf32>
    %22 = arith.addf %19, %21 : vector<8x1024xf32>
    %c0_17 = arith.constant 0 : index
    %c0_18 = arith.constant 0 : index
    %23 = vector.load %arg8[%c0_17, %c0_18] : memref<8x1024xf32, #tpu.memory_space<vmem>>, vector<8x1024xf32>
    tpu.vector_store %arg8[%c0_17, %c0_18], %22 {strides = array<i32>} : memref<8x1024xf32, #tpu.memory_space<vmem>>, vector<8x1024xf32>,
    return
  }
  func.func @transform_0(%arg0: i32) -> (i32, i32) {
    %c0_i32 = arith.constant 0 : i32
    %c0_i32_0 = arith.constant 0 : i32
    return %arg0, %c0_i32 : i32, i32
  }
  func.func @transform_1(%arg0: i32) -> (i32, i32) {
    %c0_i32 = arith.constant 0 : i32
    %c0_i32_0 = arith.constant 0 : i32
    %c0_i32_1 = arith.constant 0 : i32
    return %c0_i32, %c0_i32_0 : i32, i32
  }
  func.func @transform_2(%arg0: i32) -> (i32, i32) {
    %c0_i32 = arith.constant 0 : i32
    %c0_i32_0 = arith.constant 0 : i32
    %c0_i32_1 = arith.constant 0 : i32
    return %c0_i32, %c0_i32_0 : i32, i32
  }
  func.func @transform_3(%arg0: i32) -> (i32, i32) {
    %c0_i32 = arith.constant 0 : i32
    %c0_i32_0 = arith.constant 0 : i32
    %c0_i32_1 = arith.constant 0 : i32
    return %c0_i32, %c0_i32_0 : i32, i32
  }
  func.func @transform_4(%arg0: i32) -> (i32, i32) {
    %c0_i32 = arith.constant 0 : i32
    %c0_i32_0 = arith.constant 0 : i32
    %c0_i32_1 = arith.constant 0 : i32
    return %c0_i32, %c0_i32_0 : i32, i32
  }
  func.func @transform_5(%arg0: i32) -> (i32, i32) {
    %c0_i32 = arith.constant 0 : i32
    %c0_i32_0 = arith.constant 0 : i32
    %c0_i32_1 = arith.constant 0 : i32
    return %c0_i32, %c0_i32_0 : i32, i32
  }
  func.func @transform_6(%arg0: i32) -> (i32, i32) {
    %c0_i32 = arith.constant 0 : i32
    %c0_i32_0 = arith.constant 0 : i32
    %c0_i32_1 = arith.constant 0 : i32
    return %c0_i32, %c0_i32_0 : i32, i32
  }
  func.func @transform_7(%arg0: i32) -> (i32, i32) {
    %c0_i32 = arith.constant 0 : i32
    %c0_i32_0 = arith.constant 0 : i32
    return %arg0, %c0_i32 : i32, i32
  }
}

</mosaic_0001>

<bundles_post_ra>
// kernel: fc_decoder.1
= control target key start
LH: loop header
LB: loop body
LE: loop exit
PB: predicated region body
PF: predicated region fallthrough
CT: control target
= control target key end

     0   :  { %12 = vsyncpa [#allocation3], 0  ;;  %s2939_s0 = inlined_call_operand.vmem [shape: f32[8,32], index: 0, kind: input, shape index: {}]   ;;  %s2940_s1 = inlined_call_operand.hbm [shape: bf16[32,128], index: 1, kind: input, shape index: {}]   ;;  %s2941_s2 = inlined_call_operand.vmem [shape: f32[1,128], index: 2, kind: input, shape index: {}]   ;;  %s2942_s3 = inlined_call_operand.hbm [shape: bf16[128,512], index: 3, kind: input, shape index: {}]   ;;  %s2943_s4 = inlined_call_operand.vmem [shape: f32[1,512], index: 4, kind: input, shape index: {}]   ;;  %s2944_s5 = inlined_call_operand.hbm [shape: bf16[512,1024], index: 5, kind: input, shape index: {}]   ;;  %s2945_s6 = inlined_call_operand.vmem [shape: f32[1,1024], index: 6, kind: input, shape index: {}]   ;;  %s2946_s7 = inlined_call_operand.vmem [shape: f32[8,1024], index: 7, kind: output, shape index: {}]  }
   0x1   :  { %13 = vsyncpa [#allocation5], 0  ;;  %s2792_s24 = smov [#allocation4]  }
   0x2   :  { %s35_s25 = sshll.u32 %s2792_s24, 4  ;;  %s36_s25 = int_to_ptr.vmem [resolvable:$true] %s35_s25 }
   0x3   :  { %s2736_s26 = scalar_lea.vmem %s36_s25, 4096  ;;  %p2741_p1 = scmp.lt.s32.totalorder %s36_s25, %s36_s25 }
   0x4   :  { %p2737_p0 = scmp.ne.s32.totalorder %s36_s25, %s2736_s26  ;;  %p2742_p2 = scmp.lt.s32.totalorder %s2736_s26, %s2736_s26 }
   0x6   :  { %p2743_p3 = por %p2742_p2, %p2741_p1 }
   0x8   :  { %p2744_p4 = pnand %p2743_p3, %p2737_p0 }
   0xa   :  { %2747 = shalt.err (!%p2744_p4)
}
   0xb   :  { %s2793_s27 = smov 256   ;;  %s2794_s28 = smov 16  }
   0xc   :  { %41 = dma.hbm_to_vmem [thread:$0]  %s2942_s3, 4096, %s36_s25, [#allocation5], %s2793_s27, %s2793_s27, %s2794_s28  }
   0xd   :  { %s2795_s8 = smov [#allocation2]  }
   0xe   :  { %s21_s9 = sshll.u32 %s2795_s8, 4  ;;  %s22_s9 = int_to_ptr.vmem [resolvable:$true] %s21_s9 }
   0xf   :  { %s2756_s10 = scalar_lea.vmem %s22_s9, 256  ;;  %p2761_p6 = scmp.lt.s32.totalorder %s22_s9, %s22_s9 }
  0x10   :  { %p2757_p5 = scmp.ne.s32.totalorder %s22_s9, %s2756_s10  ;;  %p2762_p7 = scmp.lt.s32.totalorder %s2756_s10, %s2756_s10 }
  0x12   :  { %p2763_p8 = por %p2762_p7, %p2761_p6 }
  0x14   :  { %p2764_p9 = pnand %p2763_p8, %p2757_p5 }
  0x16   :  { %2767 = shalt.err (!%p2764_p9)
}
  0x17   :  { %s2796_s11 = smov 64   ;;  %s2797_s12 = smov 4  }
  0x18   :  { %27 = dma.hbm_to_vmem [thread:$0]  %s2940_s1, 256, %s22_s9, [#allocation3], %s2796_s11, %s2796_s11, %s2797_s12  }
  0x19   :  { %s2798_s15 = smov [#allocation6]  }
  0x1a   :  { %s49_s16 = sshll.u32 %s2798_s15, 4  ;;  %s50_s16 = int_to_ptr.vmem [resolvable:$true] %s49_s16 }
  0x1b   :  { %s2776_s3 = scalar_lea.vmem %s50_s16, 32768  ;;  %p2781_p11 = scmp.lt.s32.totalorder %s50_s16, %s50_s16 }
  0x1c   :  { %p2777_p10 = scmp.ne.s32.totalorder %s50_s16, %s2776_s3  ;;  %p2782_p12 = scmp.lt.s32.totalorder %s2776_s3, %s2776_s3 }
  0x1e   :  { %p2783_p13 = por %p2782_p12, %p2781_p11 }
  0x20   :  { %p2784_p0 = pnand %p2783_p13, %p2777_p10 }
  0x22   :  { %2787 = shalt.err (!%p2784_p0)
}
  0x23   :  { %s2799_s17 = smov 512   ;;  %s2800_s18 = smov 32  }
  0x24   :  { %55 = dma.hbm_to_vmem [thread:$0]  %s2944_s5, 32768, %s50_s16, [#allocation5], %s2799_s17, %s2799_s17, %s2800_s18  }
  0x25   :  { %2788 = dma.done.wait [#allocation3], 256  }
  0x26   :  { %2789 = vsyncadd [#allocation3], 4294967040 }
  0x27   :  { %2790 = dma.done.wait [#allocation5], 36864  }
  0x28   :  { %2791 = vsyncadd [#allocation5], 4294930432  ;;  %v2801_v0 = vmov 0.0   ;;  %vm2802_vm0 = vmmov 0   ;;  %v2678_v1 = vld [vmem:[#allocation2 + $0x8] sm:$0xff]   ;;  %v2679_v2 = vld [vmem:[#allocation2] sm:$0xff]  }
  0x29   :  { %2658 = vmatprep.subr.bf16.mxu0 %v2801_v0  ;;  %2662 = vmatprep.mubr.msk.bf16.mxu0 %vm2802_vm0, %v2801_v0  ;;  %v68_v3 = vld [vmem:[%s2939_s0] sm:$0xff]  ;;  %v2684_v5 = vld [vmem:[#allocation4 + $0xec] ss:$16 sps:$4 sm:$0xff]   ;;  %vm93_vm1 = vcmask 261120   ;;  %v2682_v9 = vld [vmem:[#allocation4 + $0xe8] ss:$16 sps:$4 sm:$0xff]  }
  0x2a   :  { %2659 = vmatpush3.bf16.msra.mxu0 %v2678_v1  ;;  %v2680_v4 = vld [vmem:[#allocation4 + $0xe4] ss:$16 sps:$4 sm:$0xff]   ;;  %v2685_v6 = vld [vmem:[#allocation4 + $0xe0] ss:$16 sps:$4 sm:$0xff]   ;;  %v69_v7 = vpack.c.bf16 %v68_v3, %v68_v3  ;;  %v2690_v10 = vld [vmem:[#allocation4 + $0xcc] ss:$16 sps:$4 sm:$0xff]  }
  0x2b   :  { %2660 = vmatprep.subr.bf16.mxu0 %v2801_v0  ;;  %353 = vmatprep.subr.bf16.mxu1 %v2680_v4  ;;  %v2686_v8 = vld [vmem:[#allocation4 + $0xc4] ss:$16 sps:$4 sm:$0xff]   ;;  %v2691_v11 = vld [vmem:[#allocation4 + $0xc0] ss:$16 sps:$4 sm:$0xff]   ;;  %v2688_v13 = vld [vmem:[#allocation4 + $0xc8] ss:$16 sps:$4 sm:$0xff]  }
  0x2c   :  { %354 = vmatpush1.bf16.msra.mxu1 %v2685_v6  ;;  %v2692_v12 = vld [vmem:[#allocation4 + $0xa4] ss:$16 sps:$4 sm:$0xff]   ;;  %v2696_v14 = vld [vmem:[#allocation4 + $0xac] ss:$16 sps:$4 sm:$0xff]   ;;  %v2697_v15 = vld [vmem:[#allocation4 + $0xa0] ss:$16 sps:$4 sm:$0xff]  }
  0x2d   :  { %355 = vmatprep.subr.bf16.mxu1 %v2686_v8  ;;  %v2698_v16 = vld [vmem:[#allocation4 + $0x84] ss:$16 sps:$4 sm:$0xff]   ;;  %v2694_v17 = vld [vmem:[#allocation4 + $0xa8] ss:$16 sps:$4 sm:$0xff]   ;;  %v2703_v18 = vld [vmem:[#allocation4 + $0x80] ss:$16 sps:$4 sm:$0xff]  }
  0x2e   :  { %2661 = vmatpush3.bf16.msra.mxu0 %v2679_v2  ;;  %v2702_v19 = vld [vmem:[#allocation4 + $0x8c] ss:$16 sps:$4 sm:$0xff]   ;;  %v2704_v20 = vld [vmem:[#allocation4 + $0x64] ss:$16 sps:$4 sm:$0xff]   ;;  %v2700_v21 = vld [vmem:[#allocation4 + $0x88] ss:$16 sps:$4 sm:$0xff]  }
  0x2f   :  { %394 = vmatprep.subr.bf16.mxu0 %v2684_v5  ;;  %v2708_v22 = vld [vmem:[#allocation4 + $0x6c] ss:$16 sps:$4 sm:$0xff]   ;;  %v2709_v23 = vld [vmem:[#allocation4 + $0x60] ss:$16 sps:$4 sm:$0xff]   ;;  %v2710_v24 = vld [vmem:[#allocation4 + $0x44] ss:$16 sps:$4 sm:$0xff]  }
  0x30   :  { %356 = vmatpush1.bf16.msra.mxu1 %v2691_v11  ;;  %v2706_v25 = vld [vmem:[#allocation4 + $0x68] ss:$16 sps:$4 sm:$0xff]   ;;  %v2715_v26 = vld [vmem:[#allocation4 + $0x40] ss:$16 sps:$4 sm:$0xff]   ;;  %v2714_v27 = vld [vmem:[#allocation4 + $0x4c] ss:$16 sps:$4 sm:$0xff]  }
  0x31   :  { %2663 = vmatmul.mubr.msk.bf16.vlgmr.msra.gmra.mxu0 %vm93_vm1, %v69_v7  ;;  %357 = vmatprep.subr.bf16.mxu1 %v2692_v12  ;;  %v2716_v28 = vld [vmem:[#allocation4 + $0x24] ss:$16 sps:$4 sm:$0xff]   ;;  %v2712_v29 = vld [vmem:[#allocation4 + $0x48] ss:$16 sps:$4 sm:$0xff]   ;;  %v2720_v30 = vld [vmem:[#allocation4 + $0x2c] ss:$16 sps:$4 sm:$0xff]  }
  0x32   :  { %395 = vmatpush1.bf16.msra.mxu0 %v2682_v9  ;;  %v2718_v31 = vld [vmem:[#allocation4 + $0x28] ss:$16 sps:$4 sm:$0xff]   ;;  %v2721_v32 = vld [vmem:[#allocation4 + $0x20] ss:$16 sps:$4 sm:$0xff]   ;;  %v2722_v33 = vld [vmem:[#allocation4 + $0x4] ss:$16 sps:$4 sm:$0xff]  }
  0x33   :  { %396 = vmatprep.subr.bf16.mxu0 %v2690_v10  ;;  %v2726_v34 = vld [vmem:[#allocation4 + $0xc] ss:$16 sps:$4 sm:$0xff]   ;;  %v2724_v35 = vld [vmem:[#allocation4 + $0x8] ss:$16 sps:$4 sm:$0xff]   ;;  %v2727_v36 = vld [vmem:[#allocation4] ss:$16 sps:$4 sm:$0xff]  }
  0x34   :  { %358 = vmatpush1.bf16.msra.mxu1 %v2697_v15  ;;  %v2803_v37 = vmov 0   ;;  %v499_v38 = vld [vmem:[#allocation6 + $0x1c0] sm:$0xff]  ;;  %v2363_v46 = vld [vmem:[%s2941_s2] ss:$0 sm:$0xff] }
  0x35   :  { %359 = vmatprep.subr.bf16.mxu1 %v2698_v16  ;;  %385 = vmatprep.mubr.bf16.mxu1 %v2803_v37  ;;  %v503_v39 = vld [vmem:[#allocation6 + $0x1e0] sm:$0xff] }
  0x36   :  { %397 = vmatpush1.bf16.msra.mxu0 %v2688_v13  ;;  %426 = vmatprep.mubr.bf16.mxu0 %v2803_v37  ;;  %v627_v40 = vld [vmem:[#allocation6 + $0x5c0] sm:$0xff]  ;;  %v2455_v41 = vcombine.low %v499_v38, %v503_v39  ;;  %v2456_v42 = vcombine.high %v499_v38, %v503_v39 }
  0x37   :  { %398 = vmatprep.subr.bf16.mxu0 %v2696_v14  ;;  %v631_v43 = vld [vmem:[#allocation6 + $0x5e0] sm:$0xff] }
  0x38   :  { %360 = vmatpush1.bf16.msra.mxu1 %v2703_v18  ;;  %v2583_v44 = vcombine.low %v627_v40, %v631_v43  ;;  %v2584_v45 = vcombine.high %v627_v40, %v631_v43  ;;  %v491_v49 = vld [vmem:[#allocation6 + $0x180] sm:$0xff] }
  0x39   :  { %361 = vmatprep.subr.bf16.mxu1 %v2704_v20  ;;  %v495_v51 = vld [vmem:[#allocation6 + $0x1a0] sm:$0xff] }
  0x3a   :  { %399 = vmatpush1.bf16.msra.mxu0 %v2694_v17  ;;  %v619_v52 = vld [vmem:[#allocation6 + $0x580] sm:$0xff]  ;;  %v2448_v57 = vcombine.high %v491_v49, %v495_v51  ;;  %v2447_v0 = vcombine.low %v491_v49, %v495_v51 }
  0x3b   :  { %400 = vmatprep.subr.bf16.mxu0 %v2702_v19  ;;  %v623_v53 = vld [vmem:[#allocation6 + $0x5a0] sm:$0xff] }
  0x3c   :  { %362 = vmatpush1.bf16.msra.mxu1 %v2709_v23  ;;  %v2576_v58 = vcombine.high %v619_v52, %v623_v53  ;;  %v483_v59 = vld [vmem:[#allocation6 + $0x140] sm:$0xff]  ;;  %v2575_v1 = vcombine.low %v619_v52, %v623_v53 }
  0x3d   :  { %363 = vmatprep.subr.bf16.mxu1 %v2710_v24  ;;  %v487_v61 = vld [vmem:[#allocation6 + $0x160] sm:$0xff] }
  0x3e   :  { %401 = vmatpush1.bf16.msra.mxu0 %v2700_v21  ;;  %v611_v62 = vld [vmem:[#allocation6 + $0x540] sm:$0xff]  ;;  %v2440_v2 = vcombine.high %v483_v59, %v487_v61  ;;  %v2439_v8 = vcombine.low %v483_v59, %v487_v61 }
  0x3f   :  { %402 = vmatprep.subr.bf16.mxu0 %v2708_v22  ;;  %v615_v63 = vld [vmem:[#allocation6 + $0x560] sm:$0xff] }
  0x40   :  { %364 = vmatpush1.bf16.msra.mxu1 %v2715_v26  ;;  %v2568_v3 = vcombine.high %v611_v62, %v615_v63  ;;  %v475_v4 = vld [vmem:[#allocation6 + $0x100] sm:$0xff]  ;;  %v2567_v9 = vcombine.low %v611_v62, %v615_v63 }
  0x41   :  { %365 = vmatprep.subr.bf16.mxu1 %v2716_v28  ;;  %v479_v5 = vld [vmem:[#allocation6 + $0x120] sm:$0xff] }
  0x42   :  { %403 = vmatpush1.bf16.msra.mxu0 %v2706_v25  ;;  %v603_v6 = vld [vmem:[#allocation6 + $0x500] sm:$0xff]  ;;  %v2432_v10 = vcombine.high %v475_v4, %v479_v5  ;;  %v2431_v16 = vcombine.low %v475_v4, %v479_v5 }
  0x43   :  { %404 = vmatprep.subr.bf16.mxu0 %v2714_v27  ;;  %v607_v7 = vld [vmem:[#allocation6 + $0x520] sm:$0xff] }
  0x44   :  { %366 = vmatpush1.bf16.msra.mxu1 %v2721_v32  ;;  %v2560_v11 = vcombine.high %v603_v6, %v607_v7  ;;  %v467_v12 = vld [vmem:[#allocation6 + $0xc0] sm:$0xff]  ;;  %v2559_v17 = vcombine.low %v603_v6, %v607_v7 }
  0x45   :  { %367 = vmatprep.subr.bf16.mxu1 %v2722_v33  ;;  %v471_v13 = vld [vmem:[#allocation6 + $0xe0] sm:$0xff] }
  0x46   :  { %405 = vmatpush1.bf16.msra.mxu0 %v2712_v29  ;;  %v595_v14 = vld [vmem:[#allocation6 + $0x4c0] sm:$0xff]  ;;  %v2424_v18 = vcombine.high %v467_v12, %v471_v13  ;;  %v2423_v24 = vcombine.low %v467_v12, %v471_v13 }
  0x47   :  { %406 = vmatprep.subr.bf16.mxu0 %v2720_v30  ;;  %v599_v15 = vld [vmem:[#allocation6 + $0x4e0] sm:$0xff] }
  0x48   :  { %368 = vmatpush1.bf16.msra.mxu1 %v2727_v36  ;;  %v2552_v19 = vcombine.high %v595_v14, %v599_v15  ;;  %v459_v20 = vld [vmem:[#allocation6 + $0x80] sm:$0xff]  ;;  %v2551_v25 = vcombine.low %v595_v14, %v599_v15 }
  0x49   :  { %2021 = vmatprep.subr.bf16.mxu1 %v2456_v42  ;;  %v463_v21 = vld [vmem:[#allocation6 + $0xa0] sm:$0xff] }
  0x4a   :  { %407 = vmatpush1.bf16.msra.mxu0 %v2718_v31  ;;  %v587_v22 = vld [vmem:[#allocation6 + $0x480] sm:$0xff]  ;;  %v2416_v26 = vcombine.high %v459_v20, %v463_v21  ;;  %v2415_v32 = vcombine.low %v459_v20, %v463_v21 }
  0x4b   :  { %408 = vmatprep.subr.bf16.mxu0 %v2726_v34  ;;  %v591_v23 = vld [vmem:[#allocation6 + $0x4a0] sm:$0xff] }
  0x4c   :  { %v2544_v27 = vcombine.high %v587_v22, %v591_v23  ;;  %v451_v28 = vld [vmem:[#allocation6 + $0x40] sm:$0xff]  ;;  %v2543_v33 = vcombine.low %v587_v22, %v591_v23 }
  0x4d   :  { %v455_v29 = vld [vmem:[#allocation6 + $0x60] sm:$0xff] }
  0x4e   :  { %409 = vmatpush1.bf16.msra.mxu0 %v2724_v35  ;;  %v579_v30 = vld [vmem:[#allocation6 + $0x440] sm:$0xff]  ;;  %v2408_v34 = vcombine.high %v451_v28, %v455_v29  ;;  %v2407_v40 = vcombine.low %v451_v28, %v455_v29 }
  0x4f   :  { %2062 = vmatprep.subr.bf16.mxu0 %v2584_v45  ;;  %v583_v31 = vld [vmem:[#allocation6 + $0x460] sm:$0xff] }
  0x50   :  { %v2536_v35 = vcombine.high %v579_v30, %v583_v31  ;;  %v443_v36 = vld [vmem:[#allocation6] sm:$0xff] }
  0x51   :  { %v447_v37 = vld [vmem:[#allocation6 + $0x20] sm:$0xff] }
  0x52   :  { %v571_v38 = vld [vmem:[#allocation6 + $0x400] sm:$0xff]  ;;  %v2400_v42 = vcombine.high %v443_v36, %v447_v37 }
  0x53   :  { %v575_v39 = vld [vmem:[#allocation6 + $0x420] sm:$0xff] }
  0x54   :  { %v2528_v43 = vcombine.high %v571_v38, %v575_v39  ;;  %v567_v45 = vld [vmem:[#allocation6 + $0x3e0] sm:$0xff]  ;;  %v2527_v49 = vcombine.low %v571_v38, %v575_v39 }
  0x55   :  { %v555_v52 = vld [vmem:[#allocation6 + $0x380] sm:$0xff] }
  0x56   :  { %v559_v53 = vld [vmem:[#allocation6 + $0x3a0] sm:$0xff] }
  0x57   :  { %v551_v61 = vld [vmem:[#allocation6 + $0x360] sm:$0xff] }
  0x58   :  { %v675_v62 = vld [vmem:[#allocation6 + $0x740] sm:$0xff] }
  0x59   :  { %v679_v63 = vld [vmem:[#allocation6 + $0x760] sm:$0xff] }
  0x5a   :  { %v539_v4 = vld [vmem:[#allocation6 + $0x300] sm:$0xff] }
  0x5b   :  { %v543_v5 = vld [vmem:[#allocation6 + $0x320] sm:$0xff] }
  0x5c   :  { %v667_v6 = vld [vmem:[#allocation6 + $0x700] sm:$0xff] }
  0x5d   :  { %v671_v7 = vld [vmem:[#allocation6 + $0x720] sm:$0xff] }
  0x5e   :  { %v531_v12 = vld [vmem:[#allocation6 + $0x2c0] sm:$0xff] }
  0x5f   :  { %v535_v13 = vld [vmem:[#allocation6 + $0x2e0] sm:$0xff] }
  0x60   :  { %v659_v14 = vld [vmem:[#allocation6 + $0x6c0] sm:$0xff] }
  0x61   :  { %v663_v15 = vld [vmem:[#allocation6 + $0x6e0] sm:$0xff] }
  0x62   :  { %v523_v20 = vld [vmem:[#allocation6 + $0x280] sm:$0xff] }
  0x63   :  { %v527_v21 = vld [vmem:[#allocation6 + $0x2a0] sm:$0xff] }
  0x64   :  { %v651_v22 = vld [vmem:[#allocation6 + $0x680] sm:$0xff]  ;;  %v2479_v28 = vcombine.low %v523_v20, %v527_v21 }
  0x65   :  { %v655_v23 = vld [vmem:[#allocation6 + $0x6a0] sm:$0xff] }
  0x66   :  { %v2607_v29 = vcombine.low %v651_v22, %v655_v23  ;;  %v507_v38 = vld [vmem:[#allocation6 + $0x200] sm:$0xff] }
  0x67   :  { %v511_v39 = vld [vmem:[#allocation6 + $0x220] sm:$0xff] }
  0xf1   :  { %v131_v47 = vpop.f32.mrf.mxu0 }
  0xf2   :  { %v132_v48 = vadd.f32 %v2363_v46, %v131_v47  ;;  %v691_v46 = vld [vmem:[#allocation6 + $0x7c0] sm:$0xff] }
  0xf3   :  { %v2664_v50 = vpop.f32.mrf.mxu0  ;;  %v695_v47 = vld [vmem:[#allocation6 + $0x7e0] sm:$0xff] }
  0xf4   :  { %v137_v54 = vmax.f32 %v132_v48, 0.0  ;;  %v2399_v48 = vcombine.low %v443_v36, %v447_v37  ;;  %v2648_v51 = vcombine.high %v691_v46, %v695_v47 }
  0xf5   :  { %v134_v55 = vpop.f32.mrf.mxu0 }
  0xf6   :  { %v138_v56 = vpack.c.bf16 %v137_v54, %v137_v54  ;;  %v683_v54 = vld [vmem:[#allocation6 + $0x780] sm:$0xff] }
  0xf7   :  { %v2665_v60 = vpop.f32.mrf.mxu0  ;;  %v687_v55 = vld [vmem:[#allocation6 + $0x7a0] sm:$0xff] }
  0xf8   :  { %386 = vmatmul.mubr.bf16.vlgmr.msra.gmra.mxu1 %v138_v56  ;;  %427 = vmatmul.mubr.bf16.vlgmr.msra.gmra.mxu0 %v138_v56  ;;  %v2640_v59 = vcombine.high %v683_v54, %v687_v55  ;;  %v547_v60 = vld [vmem:[#allocation6 + $0x340] sm:$0xff] }
  0xf9   :  { %2022 = vmatpush1.bf16.msra.mxu1 %v2455_v41  ;;  %2063 = vmatpush1.bf16.msra.mxu0 %v2583_v44  ;;  %v2535_v41 = vcombine.low %v579_v30, %v583_v31  ;;  %v563_v44 = vld [vmem:[#allocation6 + $0x3c0] sm:$0xff] }
  0xfa   :  { %2023 = vmatprep.subr.bf16.mxu1 %v2448_v57  ;;  %2064 = vmatprep.subr.bf16.mxu0 %v2576_v58  ;;  %v2520_v50 = vcombine.high %v563_v44, %v567_v45  ;;  %v2519_v56 = vcombine.low %v563_v44, %v567_v45  ;;  %v2647_v57 = vcombine.low %v691_v46, %v695_v47  ;;  %v515_v30 = vld [vmem:[#allocation6 + $0x240] sm:$0xff]  ;;  %v500_v46 = vld [vmem:[#allocation6 + $0x1c8] sm:$0xff] }
  0xfb   :  { %v2512_v58 = vcombine.high %v555_v52, %v559_v53  ;;  %v519_v31 = vld [vmem:[#allocation6 + $0x260] sm:$0xff]  ;;  %v504_v47 = vld [vmem:[#allocation6 + $0x1e8] sm:$0xff] }
  0xfd   :  { %2024 = vmatpush1.bf16.msra.mxu1 %v2447_v0  ;;  %2065 = vmatpush1.bf16.msra.mxu0 %v2575_v1  ;;  %v2511_v0 = vcombine.low %v555_v52, %v559_v53  ;;  %v2639_v1 = vcombine.low %v683_v54, %v687_v55  ;;  %v173_v54 = vlaneseq }
  0xfe   :  { %2025 = vmatprep.subr.bf16.mxu1 %v2440_v2  ;;  %2066 = vmatprep.subr.bf16.mxu0 %v2568_v3  ;;  %v2504_v2 = vcombine.high %v547_v60, %v551_v61  ;;  %v2632_v3 = vcombine.high %v675_v62, %v679_v63 }
  0xff   :  { %v2859_v55 = vshrl.u32 %v173_v54, 7  ;;  %v592_v54 = vld [vmem:[#allocation6 + $0x4a8] sm:$0xff] }
 0x101   :  { %2026 = vmatpush1.bf16.msra.mxu1 %v2439_v8  ;;  %2067 = vmatpush1.bf16.msra.mxu0 %v2567_v9  ;;  %v2503_v8 = vcombine.low %v547_v60, %v551_v61  ;;  %v2631_v9 = vcombine.low %v675_v62, %v679_v63  ;;  %v187_v60 = vsub.s32 3, %v2859_v55 }
 0x102   :  { %2027 = vmatprep.subr.bf16.mxu1 %v2432_v10  ;;  %2068 = vmatprep.subr.bf16.mxu0 %v2560_v11  ;;  %v2496_v10 = vcombine.high %v539_v4, %v543_v5  ;;  %v2624_v11 = vcombine.high %v667_v6, %v671_v7 }
 0x105   :  { %2028 = vmatpush1.bf16.msra.mxu1 %v2431_v16  ;;  %2069 = vmatpush1.bf16.msra.mxu0 %v2559_v17  ;;  %v2495_v16 = vcombine.low %v539_v4, %v543_v5  ;;  %v2623_v17 = vcombine.low %v667_v6, %v671_v7 }
 0x106   :  { %2029 = vmatprep.subr.bf16.mxu1 %v2424_v18  ;;  %2070 = vmatprep.subr.bf16.mxu0 %v2552_v19  ;;  %v2488_v18 = vcombine.high %v531_v12, %v535_v13  ;;  %v2616_v19 = vcombine.high %v659_v14, %v663_v15 }
 0x109   :  { %2030 = vmatpush1.bf16.msra.mxu1 %v2423_v24  ;;  %2071 = vmatpush1.bf16.msra.mxu0 %v2551_v25  ;;  %v2487_v24 = vcombine.low %v531_v12, %v535_v13  ;;  %v2615_v25 = vcombine.low %v659_v14, %v663_v15  ;;  %v492_v15 = vld [vmem:[#allocation6 + $0x188] sm:$0xff] }
 0x10a   :  { %2031 = vmatprep.subr.bf16.mxu1 %v2416_v26  ;;  %2072 = vmatprep.subr.bf16.mxu0 %v2544_v27  ;;  %v2480_v26 = vcombine.high %v523_v20, %v527_v21  ;;  %v2608_v27 = vcombine.high %v651_v22, %v655_v23  ;;  %v624_v20 = vld [vmem:[#allocation6 + $0x5a8] sm:$0xff] }
 0x10d   :  { %2032 = vmatpush1.bf16.msra.mxu1 %v2415_v32  ;;  %2073 = vmatpush1.bf16.msra.mxu0 %v2543_v33  ;;  %v643_v32 = vld [vmem:[#allocation6 + $0x640] sm:$0xff]  ;;  %v2472_v33 = vcombine.high %v515_v30, %v519_v31 }
 0x10e   :  { %2033 = vmatprep.subr.bf16.mxu1 %v2408_v34  ;;  %2074 = vmatprep.subr.bf16.mxu0 %v2536_v35  ;;  %v647_v34 = vld [vmem:[#allocation6 + $0x660] sm:$0xff]  ;;  %v2471_v35 = vcombine.low %v515_v30, %v519_v31  ;;  %v616_v30 = vld [vmem:[#allocation6 + $0x568] sm:$0xff] }
 0x10f   :  { %v2599_v36 = vcombine.low %v643_v32, %v647_v34  ;;  %v2600_v37 = vcombine.high %v643_v32, %v647_v34 }
 0x111   :  { %2034 = vmatpush1.bf16.msra.mxu1 %v2407_v40  ;;  %2075 = vmatpush1.bf16.msra.mxu0 %v2535_v41  ;;  %v635_v40 = vld [vmem:[#allocation6 + $0x600] sm:$0xff]  ;;  %v2464_v41 = vcombine.high %v507_v38, %v511_v39 }
 0x112   :  { %2035 = vmatprep.subr.bf16.mxu1 %v2400_v42  ;;  %2076 = vmatprep.subr.bf16.mxu0 %v2528_v43  ;;  %v639_v42 = vld [vmem:[#allocation6 + $0x620] sm:$0xff]  ;;  %v2463_v43 = vcombine.low %v507_v38, %v511_v39  ;;  %v608_v38 = vld [vmem:[#allocation6 + $0x528] sm:$0xff] }
 0x113   :  { %v2591_v44 = vcombine.low %v635_v40, %v639_v42  ;;  %v2592_v45 = vcombine.high %v635_v40, %v639_v42 }
 0x115   :  { %2036 = vmatpush1.bf16.msra.mxu1 %v2399_v48  ;;  %2077 = vmatpush1.bf16.msra.mxu0 %v2527_v49  ;;  %v628_v48 = vld [vmem:[#allocation6 + $0x5c8] sm:$0xff]  ;;  %v2458_v49 = vcombine.high %v500_v46, %v504_v47 }
 0x116   :  { %2037 = vmatprep.subr.bf16.mxu1 %v2520_v50  ;;  %2078 = vmatprep.subr.bf16.mxu0 %v2648_v51  ;;  %v632_v50 = vld [vmem:[#allocation6 + $0x5e8] sm:$0xff]  ;;  %v2457_v51 = vcombine.low %v500_v46, %v504_v47 }
 0x117   :  { %v2585_v52 = vcombine.low %v628_v48, %v632_v50  ;;  %v2586_v53 = vcombine.high %v628_v48, %v632_v50  ;;  %v600_v46 = vld [vmem:[#allocation6 + $0x4e8] sm:$0xff] }
 0x119   :  { %2038 = vmatpush2.bf16.msra.mxu1 %v2519_v56  ;;  %2079 = vmatpush2.bf16.msra.mxu0 %v2647_v57  ;;  %v175_v56 = vsub.s32 0, %v2859_v55  ;;  %v183_v57 = vsub.s32 2, %v2859_v55 }
 0x11a   :  { %2039 = vmatprep.subr.bf16.mxu1 %v2512_v58  ;;  %2080 = vmatprep.subr.bf16.mxu0 %v2640_v59  ;;  %v171_v58 = vld [vmem:[%s2943_s4] sm:$0xf]  ;;  %v179_v59 = vsub.s32 1, %v2859_v55 }
 0x11b   :  { %v176_v61 = vrot.slane %v171_v58, %v175_v56  ;;  %v184_v62 = vrot.slane %v171_v58, %v183_v57 }
 0x11c   :  { %v180_v63 = vrot.slane %v171_v58, %v179_v59 }
 0x11d   :  { %2040 = vmatpush2.bf16.msra.mxu1 %v2511_v0  ;;  %2081 = vmatpush2.bf16.msra.mxu0 %v2639_v1  ;;  %v188_v0 = vrot.slane %v171_v58, %v187_v60 }
 0x11e   :  { %2041 = vmatprep.subr.bf16.mxu1 %v2504_v2  ;;  %2082 = vmatprep.subr.bf16.mxu0 %v2632_v3 }
 0x121   :  { %2042 = vmatpush2.bf16.msra.mxu1 %v2503_v8  ;;  %2083 = vmatpush2.bf16.msra.mxu0 %v2631_v9 }
 0x122   :  { %2043 = vmatprep.subr.bf16.mxu1 %v2496_v10  ;;  %2084 = vmatprep.subr.bf16.mxu0 %v2624_v11 }
 0x125   :  { %2044 = vmatpush2.bf16.msra.mxu1 %v2495_v16  ;;  %2085 = vmatpush2.bf16.msra.mxu0 %v2623_v17 }
 0x126   :  { %2045 = vmatprep.subr.bf16.mxu1 %v2488_v18  ;;  %2086 = vmatprep.subr.bf16.mxu0 %v2616_v19  ;;  %v496_v18 = vld [vmem:[#allocation6 + $0x1a8] sm:$0xff] }
 0x127   :  { %v620_v19 = vld [vmem:[#allocation6 + $0x588] sm:$0xff]  ;;  %v2449_v31 = vcombine.low %v492_v15, %v496_v18 }
 0x128   :  { %v2577_v32 = vcombine.low %v620_v19, %v624_v20 }
 0x129   :  { %2046 = vmatpush2.bf16.msra.mxu1 %v2487_v24  ;;  %2087 = vmatpush2.bf16.msra.mxu0 %v2615_v25  ;;  %v484_v25 = vld [vmem:[#allocation6 + $0x148] sm:$0xff] }
 0x12a   :  { %2047 = vmatprep.subr.bf16.mxu1 %v2480_v26  ;;  %2088 = vmatprep.subr.bf16.mxu0 %v2608_v27  ;;  %v2450_v26 = vcombine.high %v492_v15, %v496_v18  ;;  %v2578_v27 = vcombine.high %v620_v19, %v624_v20  ;;  %v692_v18 = vld [vmem:[#allocation6 + $0x7c8] sm:$0xff] }
 0x12b   :  { %v696_v19 = vld [vmem:[#allocation6 + $0x7e8] sm:$0xff] }
 0x12d   :  { %2048 = vmatpush2.bf16.msra.mxu1 %v2479_v28  ;;  %2089 = vmatpush2.bf16.msra.mxu0 %v2607_v29  ;;  %v488_v28 = vld [vmem:[#allocation6 + $0x168] sm:$0xff] }
 0x12e   :  { %2049 = vmatprep.subr.bf16.mxu1 %v2472_v33  ;;  %2090 = vmatprep.subr.bf16.mxu0 %v2600_v37  ;;  %v612_v29 = vld [vmem:[#allocation6 + $0x548] sm:$0xff]  ;;  %v2442_v33 = vcombine.high %v484_v25, %v488_v28  ;;  %v2441_v39 = vcombine.low %v484_v25, %v488_v28 }
 0x12f   :  { %v2570_v34 = vcombine.high %v612_v29, %v616_v30  ;;  %v604_v37 = vld [vmem:[#allocation6 + $0x508] sm:$0xff]  ;;  %v2569_v40 = vcombine.low %v612_v29, %v616_v30 }
 0x130   :  { %v2562_v42 = vcombine.high %v604_v37, %v608_v38  ;;  %v2561_v48 = vcombine.low %v604_v37, %v608_v38  ;;  %v556_v28 = vld [vmem:[#allocation6 + $0x388] sm:$0xff] }
 0x131   :  { %2050 = vmatpush2.bf16.msra.mxu1 %v2471_v35  ;;  %2091 = vmatpush2.bf16.msra.mxu0 %v2599_v36  ;;  %v476_v35 = vld [vmem:[#allocation6 + $0x108] sm:$0xff] }
 0x132   :  { %2051 = vmatprep.subr.bf16.mxu1 %v2464_v41  ;;  %2092 = vmatprep.subr.bf16.mxu0 %v2592_v45  ;;  %v480_v36 = vld [vmem:[#allocation6 + $0x128] sm:$0xff] }
 0x133   :  { %v2434_v41 = vcombine.high %v476_v35, %v480_v36  ;;  %v596_v45 = vld [vmem:[#allocation6 + $0x4c8] sm:$0xff]  ;;  %v2433_v47 = vcombine.low %v476_v35, %v480_v36 }
 0x134   :  { %v2554_v50 = vcombine.high %v596_v45, %v600_v46  ;;  %v560_v29 = vld [vmem:[#allocation6 + $0x3a8] sm:$0xff] }
 0x135   :  { %2052 = vmatpush2.bf16.msra.mxu1 %v2463_v43  ;;  %2093 = vmatpush2.bf16.msra.mxu0 %v2591_v44  ;;  %v468_v43 = vld [vmem:[#allocation6 + $0xc8] sm:$0xff] }
 0x136   :  { %2103 = vmatprep.subr.bf16.mxu1 %v2458_v49  ;;  %2144 = vmatprep.subr.bf16.mxu0 %v2586_v53  ;;  %v472_v44 = vld [vmem:[#allocation6 + $0xe8] sm:$0xff] }
 0x137   :  { %v2426_v49 = vcombine.high %v468_v43, %v472_v44  ;;  %v588_v53 = vld [vmem:[#allocation6 + $0x488] sm:$0xff]  ;;  %v2425_v58 = vcombine.low %v468_v43, %v472_v44 }
 0x138   :  { %v684_v30 = vld [vmem:[#allocation6 + $0x788] sm:$0xff] }
 0x139   :  { %v548_v36 = vld [vmem:[#allocation6 + $0x348] sm:$0xff] }
 0x13a   :  { %v552_v37 = vld [vmem:[#allocation6 + $0x368] sm:$0xff] }
 0x13b   :  { %v676_v38 = vld [vmem:[#allocation6 + $0x748] sm:$0xff] }
 0x13c   :  { %v540_v44 = vld [vmem:[#allocation6 + $0x308] sm:$0xff] }
 0x1b8   :  { %v387_v1 = vpop.f32.mrf.mxu1  ;;  %v428_v2 = vpop.f32.mrf.mxu0 }
 0x1b9   :  { %v388_v3 = vadd.f32 %v387_v1, %v176_v61  ;;  %v429_v4 = vadd.f32 %v428_v2, %v184_v62  ;;  %v2553_v61 = vcombine.low %v596_v45, %v600_v46  ;;  %v456_v1 = vld [vmem:[#allocation6 + $0x68] sm:$0xff] }
 0x1ba   :  { %v389_v5 = vpop.f32.mrf.mxu1  ;;  %v430_v6 = vpop.f32.mrf.mxu0  ;;  %v580_v2 = vld [vmem:[#allocation6 + $0x448] sm:$0xff] }
 0x1bb   :  { %v390_v7 = vadd.f32 %v389_v5, %v180_v63  ;;  %v431_v8 = vadd.f32 %v430_v6, %v188_v0  ;;  %v435_v9 = vmax.f32 %v388_v3, 0.0  ;;  %v437_v10 = vmax.f32 %v429_v4, 0.0  ;;  %v452_v0 = vld [vmem:[#allocation6 + $0x48] sm:$0xff] }
 0x1bc   :  { %v391_v11 = vpop.f32.mrf.mxu1  ;;  %v432_v12 = vpop.f32.mrf.mxu0  ;;  %v2546_v63 = vcombine.high %v588_v53, %v592_v54  ;;  %v584_v3 = vld [vmem:[#allocation6 + $0x468] sm:$0xff]  ;;  %v2545_v5 = vcombine.low %v588_v53, %v592_v54  ;;  %v2410_v6 = vcombine.high %v452_v0, %v456_v1 }
 0x1bd   :  { %v436_v13 = vmax.f32 %v390_v7, 0.0  ;;  %v438_v14 = vmax.f32 %v431_v8, 0.0  ;;  %v2880_v23 = vpack.c.bf16 %v435_v9, %v435_v9  ;;  %v2882_v24 = vpack.c.bf16 %v437_v10, %v437_v10  ;;  %v444_v8 = vld [vmem:[#allocation6 + $0x8] sm:$0xff] }
 0x1be   :  { %v392_v16 = vpop.f32.mrf.mxu1  ;;  %v433_v17 = vpop.f32.mrf.mxu0  ;;  %v2538_v7 = vcombine.high %v580_v2, %v584_v3  ;;  %v448_v9 = vld [vmem:[#allocation6 + $0x28] sm:$0xff]  ;;  %v2409_v12 = vcombine.low %v452_v0, %v456_v1 }
 0x1bf   :  { %v2876_v21 = vpack.c.bf16 %v436_v13, %v436_v13  ;;  %v2878_v22 = vpack.c.bf16 %v438_v14, %v438_v14  ;;  %v572_v10 = vld [vmem:[#allocation6 + $0x408] sm:$0xff]  ;;  %v2537_v13 = vcombine.low %v580_v2, %v584_v3  ;;  %v2402_v14 = vcombine.high %v444_v8, %v448_v9 }
 0x1c0   :  { %v576_v11 = vld [vmem:[#allocation6 + $0x428] sm:$0xff]  ;;  %v2401_v20 = vcombine.low %v444_v8, %v448_v9 }
 0x1c1   :  { %2053 = vmatprep.mubr.bf16.mxu1 %v2876_v21  ;;  %2094 = vmatprep.mubr.bf16.mxu0 %v2878_v22  ;;  %v2530_v15 = vcombine.high %v572_v10, %v576_v11  ;;  %v564_v16 = vld [vmem:[#allocation6 + $0x3c8] sm:$0xff]  ;;  %v2529_v25 = vcombine.low %v572_v10, %v576_v11 }
 0x1c2   :  { %2054 = vmatmul.mubr.bf16.vlgmr.msra.gmra.mxu1 %v2880_v23  ;;  %2095 = vmatmul.mubr.bf16.vlgmr.msra.gmra.mxu0 %v2882_v24  ;;  %v568_v17 = vld [vmem:[#allocation6 + $0x3e8] sm:$0xff] }
 0x1c3   :  { %2104 = vmatpush1.bf16.msra.mxu1 %v2457_v51  ;;  %2145 = vmatpush1.bf16.msra.mxu0 %v2585_v52  ;;  %v460_v51 = vld [vmem:[#allocation6 + $0x88] sm:$0xff] }
 0x1c4   :  { %2135 = vmatprep.mubr.bf16.mxu1 %v2876_v21  ;;  %2176 = vmatprep.mubr.bf16.mxu0 %v2878_v22  ;;  %v464_v52 = vld [vmem:[#allocation6 + $0xa8] sm:$0xff] }
 0x1c5   :  { %2105 = vmatprep.subr.bf16.mxu1 %v2450_v26  ;;  %2146 = vmatprep.subr.bf16.mxu0 %v2578_v27  ;;  %v2418_v62 = vcombine.high %v460_v51, %v464_v52  ;;  %v2417_v4 = vcombine.low %v460_v51, %v464_v52  ;;  %v2522_v26 = vcombine.high %v564_v16, %v568_v17  ;;  %v544_v45 = vld [vmem:[#allocation6 + $0x328] sm:$0xff] }
 0x1c6   :  { %v2650_v27 = vcombine.high %v692_v18, %v696_v19  ;;  %v668_v46 = vld [vmem:[#allocation6 + $0x708] sm:$0xff] }
 0x1c7   :  { %2106 = vmatpush1.bf16.msra.mxu1 %v2449_v31  ;;  %2147 = vmatpush1.bf16.msra.mxu0 %v2577_v32  ;;  %v688_v31 = vld [vmem:[#allocation6 + $0x7a8] sm:$0xff]  ;;  %v2521_v32 = vcombine.low %v564_v16, %v568_v17 }
 0x1c8   :  { %2107 = vmatprep.subr.bf16.mxu1 %v2442_v33  ;;  %2148 = vmatprep.subr.bf16.mxu0 %v2570_v34  ;;  %v2649_v33 = vcombine.low %v692_v18, %v696_v19  ;;  %v2514_v34 = vcombine.high %v556_v28, %v560_v29  ;;  %v2642_v35 = vcombine.high %v684_v30, %v688_v31  ;;  %v532_v52 = vld [vmem:[#allocation6 + $0x2c8] sm:$0xff] }
 0x1c9   :  { %v536_v53 = vld [vmem:[#allocation6 + $0x2e8] sm:$0xff] }
 0x1ca   :  { %v660_v54 = vld [vmem:[#allocation6 + $0x6c8] sm:$0xff] }
 0x1cb   :  { %2108 = vmatpush1.bf16.msra.mxu1 %v2441_v39  ;;  %2149 = vmatpush1.bf16.msra.mxu0 %v2569_v40  ;;  %v680_v39 = vld [vmem:[#allocation6 + $0x768] sm:$0xff]  ;;  %v2513_v40 = vcombine.low %v556_v28, %v560_v29  ;;  %v501_v29 = vld [vmem:[#allocation6 + $0x1d0] sm:$0xff] }
 0x1cc   :  { %2109 = vmatprep.subr.bf16.mxu1 %v2434_v41  ;;  %2150 = vmatprep.subr.bf16.mxu0 %v2562_v42  ;;  %v2641_v41 = vcombine.low %v684_v30, %v688_v31  ;;  %v2506_v42 = vcombine.high %v548_v36, %v552_v37  ;;  %v2634_v43 = vcombine.high %v676_v38, %v680_v39  ;;  %v524_v1 = vld [vmem:[#allocation6 + $0x288] sm:$0xff]  ;;  %v505_v30 = vld [vmem:[#allocation6 + $0x1f0] sm:$0xff] }
 0x1cd   :  { %v528_v2 = vld [vmem:[#allocation6 + $0x2a8] sm:$0xff]  ;;  %v629_v31 = vld [vmem:[#allocation6 + $0x5d0] sm:$0xff] }
 0x1ce   :  { %v652_v3 = vld [vmem:[#allocation6 + $0x688] sm:$0xff] }
 0x1cf   :  { %2110 = vmatpush1.bf16.msra.mxu1 %v2433_v47  ;;  %2151 = vmatpush1.bf16.msra.mxu0 %v2561_v48  ;;  %v672_v47 = vld [vmem:[#allocation6 + $0x728] sm:$0xff]  ;;  %v2505_v48 = vcombine.low %v548_v36, %v552_v37  ;;  %v493_v37 = vld [vmem:[#allocation6 + $0x190] sm:$0xff] }
 0x1d0   :  { %2111 = vmatprep.subr.bf16.mxu1 %v2426_v49  ;;  %2152 = vmatprep.subr.bf16.mxu0 %v2554_v50  ;;  %v2633_v49 = vcombine.low %v676_v38, %v680_v39  ;;  %v2498_v50 = vcombine.high %v540_v44, %v544_v45  ;;  %v2626_v51 = vcombine.high %v668_v46, %v672_v47  ;;  %v516_v9 = vld [vmem:[#allocation6 + $0x248] sm:$0xff]  ;;  %v497_v38 = vld [vmem:[#allocation6 + $0x1b0] sm:$0xff] }
 0x1d1   :  { %v520_v10 = vld [vmem:[#allocation6 + $0x268] sm:$0xff]  ;;  %v621_v39 = vld [vmem:[#allocation6 + $0x590] sm:$0xff] }
 0x1d2   :  { %v644_v11 = vld [vmem:[#allocation6 + $0x648] sm:$0xff] }
 0x1d3   :  { %2112 = vmatpush1.bf16.msra.mxu1 %v2425_v58  ;;  %2153 = vmatpush1.bf16.msra.mxu0 %v2553_v61  ;;  %v664_v58 = vld [vmem:[#allocation6 + $0x6e8] sm:$0xff]  ;;  %v2497_v61 = vcombine.low %v540_v44, %v544_v45  ;;  %v485_v45 = vld [vmem:[#allocation6 + $0x150] sm:$0xff] }
 0x1d4   :  { %2113 = vmatprep.subr.bf16.mxu1 %v2418_v62  ;;  %2154 = vmatprep.subr.bf16.mxu0 %v2546_v63  ;;  %v2625_v62 = vcombine.low %v668_v46, %v672_v47  ;;  %v2490_v63 = vcombine.high %v532_v52, %v536_v53  ;;  %v2618_v0 = vcombine.high %v660_v54, %v664_v58  ;;  %v508_v17 = vld [vmem:[#allocation6 + $0x208] sm:$0xff]  ;;  %v489_v46 = vld [vmem:[#allocation6 + $0x170] sm:$0xff] }
 0x1d5   :  { %v512_v18 = vld [vmem:[#allocation6 + $0x228] sm:$0xff]  ;;  %v613_v47 = vld [vmem:[#allocation6 + $0x550] sm:$0xff] }
 0x1d6   :  { %v636_v19 = vld [vmem:[#allocation6 + $0x608] sm:$0xff] }
 0x1d7   :  { %2114 = vmatpush1.bf16.msra.mxu1 %v2417_v4  ;;  %2155 = vmatpush1.bf16.msra.mxu0 %v2545_v5  ;;  %v656_v4 = vld [vmem:[#allocation6 + $0x6a8] sm:$0xff]  ;;  %v2489_v5 = vcombine.low %v532_v52, %v536_v53  ;;  %v477_v53 = vld [vmem:[#allocation6 + $0x110] sm:$0xff] }
 0x1d8   :  { %2115 = vmatprep.subr.bf16.mxu1 %v2410_v6  ;;  %2156 = vmatprep.subr.bf16.mxu0 %v2538_v7  ;;  %v2617_v6 = vcombine.low %v660_v54, %v664_v58  ;;  %v2482_v7 = vcombine.high %v524_v1, %v528_v2  ;;  %v2610_v8 = vcombine.high %v652_v3, %v656_v4  ;;  %v481_v54 = vld [vmem:[#allocation6 + $0x130] sm:$0xff] }
 0x1d9   :  { %v605_v58 = vld [vmem:[#allocation6 + $0x510] sm:$0xff] }
 0x1db   :  { %2116 = vmatpush1.bf16.msra.mxu1 %v2409_v12  ;;  %2157 = vmatpush1.bf16.msra.mxu0 %v2537_v13  ;;  %v648_v12 = vld [vmem:[#allocation6 + $0x668] sm:$0xff]  ;;  %v2481_v13 = vcombine.low %v524_v1, %v528_v2  ;;  %v469_v2 = vld [vmem:[#allocation6 + $0xd0] sm:$0xff] }
 0x1dc   :  { %2117 = vmatprep.subr.bf16.mxu1 %v2402_v14  ;;  %2158 = vmatprep.subr.bf16.mxu0 %v2530_v15  ;;  %v2609_v14 = vcombine.low %v652_v3, %v656_v4  ;;  %v2474_v15 = vcombine.high %v516_v9, %v520_v10  ;;  %v2602_v16 = vcombine.high %v644_v11, %v648_v12  ;;  %v473_v3 = vld [vmem:[#allocation6 + $0xf0] sm:$0xff] }
 0x1dd   :  { %v597_v4 = vld [vmem:[#allocation6 + $0x4d0] sm:$0xff] }
 0x1df   :  { %2118 = vmatpush1.bf16.msra.mxu1 %v2401_v20  ;;  %2159 = vmatpush1.bf16.msra.mxu0 %v2529_v25  ;;  %v640_v20 = vld [vmem:[#allocation6 + $0x628] sm:$0xff]  ;;  %v2473_v25 = vcombine.low %v516_v9, %v520_v10  ;;  %v461_v10 = vld [vmem:[#allocation6 + $0x90] sm:$0xff] }
 0x1e0   :  { %2119 = vmatprep.subr.bf16.mxu1 %v2522_v26  ;;  %2160 = vmatprep.subr.bf16.mxu0 %v2650_v27  ;;  %v2601_v26 = vcombine.low %v644_v11, %v648_v12  ;;  %v2466_v27 = vcombine.high %v508_v17, %v512_v18  ;;  %v2594_v28 = vcombine.high %v636_v19, %v640_v20  ;;  %v465_v11 = vld [vmem:[#allocation6 + $0xb0] sm:$0xff] }
 0x1e1   :  { %v589_v12 = vld [vmem:[#allocation6 + $0x490] sm:$0xff] }
 0x1e3   :  { %2120 = vmatpush2.bf16.msra.mxu1 %v2521_v32  ;;  %2161 = vmatpush2.bf16.msra.mxu0 %v2649_v33  ;;  %v633_v32 = vld [vmem:[#allocation6 + $0x5f0] sm:$0xff]  ;;  %v2465_v33 = vcombine.low %v508_v17, %v512_v18 }
 0x1e4   :  { %2121 = vmatprep.subr.bf16.mxu1 %v2514_v34  ;;  %2162 = vmatprep.subr.bf16.mxu0 %v2642_v35  ;;  %v2593_v34 = vcombine.low %v636_v19, %v640_v20  ;;  %v2460_v35 = vcombine.high %v501_v29, %v505_v30  ;;  %v2588_v36 = vcombine.high %v629_v31, %v633_v32  ;;  %v453_v18 = vld [vmem:[#allocation6 + $0x50] sm:$0xff] }
 0x1e5   :  { %v457_v19 = vld [vmem:[#allocation6 + $0x70] sm:$0xff] }
 0x1e6   :  { %v581_v20 = vld [vmem:[#allocation6 + $0x450] sm:$0xff] }
 0x1e7   :  { %2122 = vmatpush2.bf16.msra.mxu1 %v2513_v40  ;;  %2163 = vmatpush2.bf16.msra.mxu0 %v2641_v41  ;;  %v625_v40 = vld [vmem:[#allocation6 + $0x5b0] sm:$0xff]  ;;  %v2459_v41 = vcombine.low %v501_v29, %v505_v30 }
 0x1e8   :  { %2123 = vmatprep.subr.bf16.mxu1 %v2506_v42  ;;  %2164 = vmatprep.subr.bf16.mxu0 %v2634_v43  ;;  %v2587_v42 = vcombine.low %v629_v31, %v633_v32  ;;  %v2452_v43 = vcombine.high %v493_v37, %v497_v38  ;;  %v2580_v44 = vcombine.high %v621_v39, %v625_v40  ;;  %v445_v30 = vld [vmem:[#allocation6 + $0x10] sm:$0xff] }
 0x1e9   :  { %v449_v31 = vld [vmem:[#allocation6 + $0x30] sm:$0xff] }
 0x1ea   :  { %v573_v32 = vld [vmem:[#allocation6 + $0x410] sm:$0xff] }
 0x1eb   :  { %2124 = vmatpush2.bf16.msra.mxu1 %v2505_v48  ;;  %2165 = vmatpush2.bf16.msra.mxu0 %v2633_v49  ;;  %v617_v48 = vld [vmem:[#allocation6 + $0x570] sm:$0xff]  ;;  %v2451_v49 = vcombine.low %v493_v37, %v497_v38 }
 0x1ec   :  { %2125 = vmatprep.subr.bf16.mxu1 %v2498_v50  ;;  %2166 = vmatprep.subr.bf16.mxu0 %v2626_v51  ;;  %v2579_v50 = vcombine.low %v621_v39, %v625_v40  ;;  %v2444_v51 = vcombine.high %v485_v45, %v489_v46  ;;  %v2572_v52 = vcombine.high %v613_v47, %v617_v48  ;;  %v565_v38 = vld [vmem:[#allocation6 + $0x3d0] sm:$0xff] }
 0x1ed   :  { %v569_v39 = vld [vmem:[#allocation6 + $0x3f0] sm:$0xff] }
 0x1ee   :  { %v693_v40 = vld [vmem:[#allocation6 + $0x7d0] sm:$0xff] }
 0x1ef   :  { %2126 = vmatpush2.bf16.msra.mxu1 %v2497_v61  ;;  %2167 = vmatpush2.bf16.msra.mxu0 %v2625_v62  ;;  %v609_v61 = vld [vmem:[#allocation6 + $0x530] sm:$0xff]  ;;  %v2443_v62 = vcombine.low %v485_v45, %v489_v46 }
 0x1f0   :  { %2127 = vmatprep.subr.bf16.mxu1 %v2490_v63  ;;  %2168 = vmatprep.subr.bf16.mxu0 %v2618_v0  ;;  %v2571_v63 = vcombine.low %v613_v47, %v617_v48  ;;  %v2436_v0 = vcombine.high %v477_v53, %v481_v54  ;;  %v2564_v1 = vcombine.high %v605_v58, %v609_v61  ;;  %v557_v46 = vld [vmem:[#allocation6 + $0x390] sm:$0xff] }
 0x1f1   :  { %v561_v47 = vld [vmem:[#allocation6 + $0x3b0] sm:$0xff] }
 0x1f2   :  { %v685_v48 = vld [vmem:[#allocation6 + $0x790] sm:$0xff] }
 0x1f3   :  { %2128 = vmatpush2.bf16.msra.mxu1 %v2489_v5  ;;  %2169 = vmatpush2.bf16.msra.mxu0 %v2617_v6  ;;  %v601_v5 = vld [vmem:[#allocation6 + $0x4f0] sm:$0xff]  ;;  %v2435_v6 = vcombine.low %v477_v53, %v481_v54 }
 0x1f4   :  { %2129 = vmatprep.subr.bf16.mxu1 %v2482_v7  ;;  %2170 = vmatprep.subr.bf16.mxu0 %v2610_v8  ;;  %v2563_v7 = vcombine.low %v605_v58, %v609_v61  ;;  %v2428_v8 = vcombine.high %v469_v2, %v473_v3  ;;  %v2556_v9 = vcombine.high %v597_v4, %v601_v5  ;;  %v549_v54 = vld [vmem:[#allocation6 + $0x350] sm:$0xff] }
 0x1f5   :  { %v553_v58 = vld [vmem:[#allocation6 + $0x370] sm:$0xff] }
 0x1f6   :  { %v677_v61 = vld [vmem:[#allocation6 + $0x750] sm:$0xff] }
 0x1f7   :  { %2130 = vmatpush2.bf16.msra.mxu1 %v2481_v13  ;;  %2171 = vmatpush2.bf16.msra.mxu0 %v2609_v14  ;;  %v593_v13 = vld [vmem:[#allocation6 + $0x4b0] sm:$0xff]  ;;  %v2427_v14 = vcombine.low %v469_v2, %v473_v3 }
 0x1f8   :  { %2131 = vmatprep.subr.bf16.mxu1 %v2474_v15  ;;  %2172 = vmatprep.subr.bf16.mxu0 %v2602_v16  ;;  %v2555_v15 = vcombine.low %v597_v4, %v601_v5  ;;  %v2420_v16 = vcombine.high %v461_v10, %v465_v11  ;;  %v2548_v17 = vcombine.high %v589_v12, %v593_v13  ;;  %v541_v3 = vld [vmem:[#allocation6 + $0x310] sm:$0xff] }
 0x1f9   :  { %v545_v4 = vld [vmem:[#allocation6 + $0x330] sm:$0xff] }
 0x1fa   :  { %v669_v5 = vld [vmem:[#allocation6 + $0x710] sm:$0xff] }
 0x1fb   :  { %2132 = vmatpush2.bf16.msra.mxu1 %v2473_v25  ;;  %2173 = vmatpush2.bf16.msra.mxu0 %v2601_v26  ;;  %v585_v25 = vld [vmem:[#allocation6 + $0x470] sm:$0xff]  ;;  %v2419_v26 = vcombine.low %v461_v10, %v465_v11 }
 0x1fc   :  { %2133 = vmatprep.subr.bf16.mxu1 %v2466_v27  ;;  %2174 = vmatprep.subr.bf16.mxu0 %v2594_v28  ;;  %v2547_v27 = vcombine.low %v589_v12, %v593_v13  ;;  %v2412_v28 = vcombine.high %v453_v18, %v457_v19  ;;  %v2540_v29 = vcombine.high %v581_v20, %v585_v25  ;;  %v533_v11 = vld [vmem:[#allocation6 + $0x2d0] sm:$0xff] }
 0x1fd   :  { %v537_v12 = vld [vmem:[#allocation6 + $0x2f0] sm:$0xff] }
 0x1fe   :  { %v661_v13 = vld [vmem:[#allocation6 + $0x6d0] sm:$0xff] }
 0x1ff   :  { %2134 = vmatpush2.bf16.msra.mxu1 %v2465_v33  ;;  %2175 = vmatpush2.bf16.msra.mxu0 %v2593_v34  ;;  %v577_v33 = vld [vmem:[#allocation6 + $0x430] sm:$0xff]  ;;  %v2411_v34 = vcombine.low %v453_v18, %v457_v19 }
 0x200   :  { %2185 = vmatprep.subr.bf16.mxu1 %v2460_v35  ;;  %2226 = vmatprep.subr.bf16.mxu0 %v2588_v36  ;;  %v2539_v35 = vcombine.low %v581_v20, %v585_v25  ;;  %v2404_v36 = vcombine.high %v445_v30, %v449_v31  ;;  %v2532_v37 = vcombine.high %v573_v32, %v577_v33  ;;  %v525_v19 = vld [vmem:[#allocation6 + $0x290] sm:$0xff] }
 0x201   :  { %v529_v20 = vld [vmem:[#allocation6 + $0x2b0] sm:$0xff] }
 0x202   :  { %2136 = vmatmul.mubr.bf16.vlgmr.msra.gmra.mxu1 %v2880_v23  ;;  %2177 = vmatmul.mubr.bf16.vlgmr.msra.gmra.mxu0 %v2882_v24  ;;  %v653_v25 = vld [vmem:[#allocation6 + $0x690] sm:$0xff] }
 0x203   :  { %2186 = vmatpush1.bf16.msra.mxu1 %v2459_v41  ;;  %2217 = vmatprep.mubr.bf16.mxu1 %v2876_v21  ;;  %v697_v41 = vld [vmem:[#allocation6 + $0x7f0] sm:$0xff] }
 0x204   :  { %2227 = vmatpush1.bf16.msra.mxu0 %v2587_v42  ;;  %2258 = vmatprep.mubr.bf16.mxu0 %v2878_v22  ;;  %v2403_v42 = vcombine.low %v445_v30, %v449_v31  ;;  %v2652_v45 = vcombine.high %v693_v40, %v697_v41  ;;  %v517_v31 = vld [vmem:[#allocation6 + $0x250] sm:$0xff] }
 0x205   :  { %2187 = vmatprep.subr.bf16.mxu1 %v2452_v43  ;;  %2228 = vmatprep.subr.bf16.mxu0 %v2580_v44  ;;  %v2531_v43 = vcombine.low %v573_v32, %v577_v33  ;;  %v2524_v44 = vcombine.high %v565_v38, %v569_v39  ;;  %v521_v32 = vld [vmem:[#allocation6 + $0x270] sm:$0xff] }
 0x206   :  { %v645_v33 = vld [vmem:[#allocation6 + $0x650] sm:$0xff] }
 0x207   :  { %2188 = vmatpush1.bf16.msra.mxu1 %v2451_v49  ;;  %v689_v49 = vld [vmem:[#allocation6 + $0x7b0] sm:$0xff] }
 0x208   :  { %2229 = vmatpush1.bf16.msra.mxu0 %v2579_v50  ;;  %2189 = vmatprep.subr.bf16.mxu1 %v2444_v51  ;;  %v2523_v50 = vcombine.low %v565_v38, %v569_v39  ;;  %v2651_v51 = vcombine.low %v693_v40, %v697_v41  ;;  %v2644_v53 = vcombine.high %v685_v48, %v689_v49  ;;  %v509_v39 = vld [vmem:[#allocation6 + $0x210] sm:$0xff] }
 0x209   :  { %2230 = vmatprep.subr.bf16.mxu0 %v2572_v52  ;;  %v2516_v52 = vcombine.high %v557_v46, %v561_v47  ;;  %v513_v40 = vld [vmem:[#allocation6 + $0x230] sm:$0xff] }
 0x20a   :  { %v637_v41 = vld [vmem:[#allocation6 + $0x610] sm:$0xff] }
 0x20b   :  { %2190 = vmatpush1.bf16.msra.mxu1 %v2443_v62  ;;  %v681_v62 = vld [vmem:[#allocation6 + $0x770] sm:$0xff] }
 0x20c   :  { %2231 = vmatpush1.bf16.msra.mxu0 %v2571_v63  ;;  %2191 = vmatprep.subr.bf16.mxu1 %v2436_v0  ;;  %v2515_v63 = vcombine.low %v557_v46, %v561_v47  ;;  %v2643_v0 = vcombine.low %v685_v48, %v689_v49  ;;  %v2636_v2 = vcombine.high %v677_v61, %v681_v62  ;;  %v502_v47 = vld [vmem:[#allocation6 + $0x1d8] sm:$0xff] }
 0x20d   :  { %2232 = vmatprep.subr.bf16.mxu0 %v2564_v1  ;;  %v2508_v1 = vcombine.high %v549_v54, %v553_v58  ;;  %v506_v48 = vld [vmem:[#allocation6 + $0x1f8] sm:$0xff] }
 0x20e   :  { %v630_v49 = vld [vmem:[#allocation6 + $0x5d8] sm:$0xff] }
 0x20f   :  { %2192 = vmatpush1.bf16.msra.mxu1 %v2435_v6  ;;  %v673_v6 = vld [vmem:[#allocation6 + $0x730] sm:$0xff] }
 0x210   :  { %2233 = vmatpush1.bf16.msra.mxu0 %v2563_v7  ;;  %2193 = vmatprep.subr.bf16.mxu1 %v2428_v8  ;;  %v2507_v7 = vcombine.low %v549_v54, %v553_v58  ;;  %v2635_v8 = vcombine.low %v677_v61, %v681_v62  ;;  %v2628_v10 = vcombine.high %v669_v5, %v673_v6  ;;  %v494_v58 = vld [vmem:[#allocation6 + $0x198] sm:$0xff] }
 0x211   :  { %2234 = vmatprep.subr.bf16.mxu0 %v2556_v9  ;;  %v2500_v9 = vcombine.high %v541_v3, %v545_v4  ;;  %v498_v61 = vld [vmem:[#allocation6 + $0x1b8] sm:$0xff]  ;;  %v2461_v62 = vcombine.low %v502_v47, %v506_v48 }
 0x213   :  { %2194 = vmatpush1.bf16.msra.mxu1 %v2427_v14  ;;  %v665_v14 = vld [vmem:[#allocation6 + $0x6f0] sm:$0xff] }
 0x214   :  { %2235 = vmatpush1.bf16.msra.mxu0 %v2555_v15  ;;  %2195 = vmatprep.subr.bf16.mxu1 %v2420_v16  ;;  %v2499_v15 = vcombine.low %v541_v3, %v545_v4  ;;  %v2627_v16 = vcombine.low %v669_v5, %v673_v6  ;;  %v2620_v18 = vcombine.high %v661_v13, %v665_v14  ;;  %v486_v3 = vld [vmem:[#allocation6 + $0x158] sm:$0xff] }
 0x215   :  { %2236 = vmatprep.subr.bf16.mxu0 %v2548_v17  ;;  %v2492_v17 = vcombine.high %v533_v11, %v537_v12  ;;  %v490_v4 = vld [vmem:[#allocation6 + $0x178] sm:$0xff] }
 0x216   :  { %v614_v6 = vld [vmem:[#allocation6 + $0x558] sm:$0xff] }
 0x217   :  { %2196 = vmatpush1.bf16.msra.mxu1 %v2419_v26  ;;  %v657_v26 = vld [vmem:[#allocation6 + $0x6b0] sm:$0xff] }
 0x218   :  { %2237 = vmatpush1.bf16.msra.mxu0 %v2547_v27  ;;  %2197 = vmatprep.subr.bf16.mxu1 %v2412_v28  ;;  %v2491_v27 = vcombine.low %v533_v11, %v537_v12  ;;  %v2619_v28 = vcombine.low %v661_v13, %v665_v14  ;;  %v2612_v30 = vcombine.high %v653_v25, %v657_v26  ;;  %v478_v12 = vld [vmem:[#allocation6 + $0x118] sm:$0xff] }
 0x219   :  { %2238 = vmatprep.subr.bf16.mxu0 %v2540_v29  ;;  %v2484_v29 = vcombine.high %v525_v19, %v529_v20  ;;  %v482_v13 = vld [vmem:[#allocation6 + $0x138] sm:$0xff] }
 0x21a   :  { %v606_v14 = vld [vmem:[#allocation6 + $0x518] sm:$0xff] }
 0x21b   :  { %2198 = vmatpush1.bf16.msra.mxu1 %v2411_v34  ;;  %v649_v34 = vld [vmem:[#allocation6 + $0x670] sm:$0xff] }
 0x21c   :  { %2239 = vmatpush1.bf16.msra.mxu0 %v2539_v35  ;;  %2199 = vmatprep.subr.bf16.mxu1 %v2404_v36  ;;  %v2483_v35 = vcombine.low %v525_v19, %v529_v20  ;;  %v2611_v36 = vcombine.low %v653_v25, %v657_v26  ;;  %v2604_v38 = vcombine.high %v645_v33, %v649_v34  ;;  %v470_v19 = vld [vmem:[#allocation6 + $0xd8] sm:$0xff] }
 0x21d   :  { %2240 = vmatprep.subr.bf16.mxu0 %v2532_v37  ;;  %v2476_v37 = vcombine.high %v517_v31, %v521_v32  ;;  %v474_v20 = vld [vmem:[#allocation6 + $0xf8] sm:$0xff] }
 0x21e   :  { %v598_v25 = vld [vmem:[#allocation6 + $0x4d8] sm:$0xff] }
 0x21f   :  { %2200 = vmatpush1.bf16.msra.mxu1 %v2403_v42  ;;  %v641_v42 = vld [vmem:[#allocation6 + $0x630] sm:$0xff]  ;;  %v602_v26 = vld [vmem:[#allocation6 + $0x4f8] sm:$0xff] }
 0x220   :  { %2241 = vmatpush1.bf16.msra.mxu0 %v2531_v43  ;;  %2201 = vmatprep.subr.bf16.mxu1 %v2524_v44  ;;  %v2475_v43 = vcombine.low %v517_v31, %v521_v32  ;;  %v2603_v44 = vcombine.low %v645_v33, %v649_v34  ;;  %v2596_v46 = vcombine.high %v637_v41, %v641_v42  ;;  %v466_v31 = vld [vmem:[#allocation6 + $0xb8] sm:$0xff] }
 0x221   :  { %2242 = vmatprep.subr.bf16.mxu0 %v2652_v45  ;;  %v2468_v45 = vcombine.high %v509_v39, %v513_v40  ;;  %v590_v32 = vld [vmem:[#allocation6 + $0x498] sm:$0xff]  ;;  %v2429_v34 = vcombine.low %v470_v19, %v474_v20 }
 0x222   :  { %v594_v33 = vld [vmem:[#allocation6 + $0x4b8] sm:$0xff] }
 0x223   :  { %2202 = vmatpush2.bf16.msra.mxu1 %v2523_v50  ;;  %v634_v50 = vld [vmem:[#allocation6 + $0x5f8] sm:$0xff] }
 0x224   :  { %2243 = vmatpush2.bf16.msra.mxu0 %v2651_v51  ;;  %2203 = vmatprep.subr.bf16.mxu1 %v2516_v52  ;;  %v2467_v51 = vcombine.low %v509_v39, %v513_v40  ;;  %v2595_v52 = vcombine.low %v637_v41, %v641_v42  ;;  %v2590_v54 = vcombine.high %v630_v49, %v634_v50  ;;  %v458_v39 = vld [vmem:[#allocation6 + $0x78] sm:$0xff] }
 0x225   :  { %2244 = vmatprep.subr.bf16.mxu0 %v2644_v53  ;;  %v2462_v53 = vcombine.high %v502_v47, %v506_v48  ;;  %v582_v40 = vld [vmem:[#allocation6 + $0x458] sm:$0xff] }
 0x226   :  { %v586_v41 = vld [vmem:[#allocation6 + $0x478] sm:$0xff] }
 0x227   :  { %2204 = vmatpush2.bf16.msra.mxu1 %v2515_v63  ;;  %v622_v63 = vld [vmem:[#allocation6 + $0x598] sm:$0xff] }
 0x228   :  { %2245 = vmatpush2.bf16.msra.mxu0 %v2643_v0  ;;  %2205 = vmatprep.subr.bf16.mxu1 %v2508_v1  ;;  %v626_v0 = vld [vmem:[#allocation6 + $0x5b8] sm:$0xff]  ;;  %v2589_v1 = vcombine.low %v630_v49, %v634_v50 }
 0x229   :  { %2246 = vmatprep.subr.bf16.mxu0 %v2636_v2  ;;  %v2454_v2 = vcombine.high %v494_v58, %v498_v61  ;;  %v2582_v5 = vcombine.high %v622_v63, %v626_v0  ;;  %v450_v47 = vld [vmem:[#allocation6 + $0x38] sm:$0xff] }
 0x22a   :  { %v574_v48 = vld [vmem:[#allocation6 + $0x418] sm:$0xff] }
 0x22b   :  { %2206 = vmatpush2.bf16.msra.mxu1 %v2507_v7  ;;  %v618_v7 = vld [vmem:[#allocation6 + $0x578] sm:$0xff] }
 0x22c   :  { %2247 = vmatpush2.bf16.msra.mxu0 %v2635_v8  ;;  %2207 = vmatprep.subr.bf16.mxu1 %v2500_v9  ;;  %v2453_v8 = vcombine.low %v494_v58, %v498_v61  ;;  %v2581_v9 = vcombine.low %v622_v63, %v626_v0  ;;  %v2574_v11 = vcombine.high %v614_v6, %v618_v7  ;;  %v578_v49 = vld [vmem:[#allocation6 + $0x438] sm:$0xff] }
 0x22d   :  { %2248 = vmatprep.subr.bf16.mxu0 %v2628_v10  ;;  %v2446_v10 = vcombine.high %v486_v3, %v490_v4  ;;  %v570_v58 = vld [vmem:[#allocation6 + $0x3f8] sm:$0xff]  ;;  %v2533_v0 = vcombine.low %v574_v48, %v578_v49 }
 0x22e   :  { %v694_v61 = vld [vmem:[#allocation6 + $0x7d8] sm:$0xff] }
 0x22f   :  { %2208 = vmatpush2.bf16.msra.mxu1 %v2499_v15  ;;  %v610_v15 = vld [vmem:[#allocation6 + $0x538] sm:$0xff] }
 0x230   :  { %2249 = vmatpush2.bf16.msra.mxu0 %v2627_v16  ;;  %2209 = vmatprep.subr.bf16.mxu1 %v2492_v17  ;;  %v2445_v16 = vcombine.low %v486_v3, %v490_v4  ;;  %v2573_v17 = vcombine.low %v614_v6, %v618_v7  ;;  %v558_v3 = vld [vmem:[#allocation6 + $0x398] sm:$0xff] }
 0x231   :  { %2250 = vmatprep.subr.bf16.mxu0 %v2620_v18  ;;  %v2438_v18 = vcombine.high %v478_v12, %v482_v13  ;;  %v562_v4 = vld [vmem:[#allocation6 + $0x3b8] sm:$0xff] }
 0x232   :  { %v690_v6 = vld [vmem:[#allocation6 + $0x7b8] sm:$0xff] }
 0x233   :  { %2210 = vmatpush2.bf16.msra.mxu1 %v2491_v27  ;;  %v2565_v27 = vcombine.low %v606_v14, %v610_v15 }
 0x234   :  { %2251 = vmatpush2.bf16.msra.mxu0 %v2619_v28  ;;  %2211 = vmatprep.subr.bf16.mxu1 %v2484_v29  ;;  %v2430_v28 = vcombine.high %v470_v19, %v474_v20  ;;  %v2558_v29 = vcombine.high %v598_v25, %v602_v26  ;;  %v546_v19 = vld [vmem:[#allocation6 + $0x338] sm:$0xff] }
 0x235   :  { %2252 = vmatprep.subr.bf16.mxu0 %v2612_v30  ;;  %v462_v30 = vld [vmem:[#allocation6 + $0x98] sm:$0xff] }
 0x236   :  { %v2421_v42 = vcombine.low %v462_v30, %v466_v31  ;;  %v670_v20 = vld [vmem:[#allocation6 + $0x718] sm:$0xff] }
 0x237   :  { %2212 = vmatpush2.bf16.msra.mxu1 %v2483_v35  ;;  %v2557_v35 = vcombine.low %v598_v25, %v602_v26  ;;  %v674_v25 = vld [vmem:[#allocation6 + $0x738] sm:$0xff] }
 0x238   :  { %2253 = vmatpush2.bf16.msra.mxu0 %v2611_v36  ;;  %2213 = vmatprep.subr.bf16.mxu1 %v2476_v37  ;;  %v2422_v36 = vcombine.high %v462_v30, %v466_v31  ;;  %v2550_v37 = vcombine.high %v590_v32, %v594_v33  ;;  %v538_v30 = vld [vmem:[#allocation6 + $0x2f8] sm:$0xff] }
 0x239   :  { %2254 = vmatprep.subr.bf16.mxu0 %v2604_v38  ;;  %v454_v38 = vld [vmem:[#allocation6 + $0x58] sm:$0xff] }
 0x23a   :  { %v2413_v50 = vcombine.low %v454_v38, %v458_v39  ;;  %v662_v31 = vld [vmem:[#allocation6 + $0x6d8] sm:$0xff] }
 0x23b   :  { %2214 = vmatpush2.bf16.msra.mxu1 %v2475_v43  ;;  %v2549_v43 = vcombine.low %v590_v32, %v594_v33  ;;  %v666_v32 = vld [vmem:[#allocation6 + $0x6f8] sm:$0xff] }
 0x23c   :  { %2255 = vmatpush2.bf16.msra.mxu0 %v2603_v44  ;;  %2215 = vmatprep.subr.bf16.mxu1 %v2468_v45  ;;  %v2414_v44 = vcombine.high %v454_v38, %v458_v39  ;;  %v2542_v45 = vcombine.high %v582_v40, %v586_v41  ;;  %v530_v38 = vld [vmem:[#allocation6 + $0x2b8] sm:$0xff] }
 0x23d   :  { %2256 = vmatprep.subr.bf16.mxu0 %v2596_v46  ;;  %v446_v46 = vld [vmem:[#allocation6 + $0x18] sm:$0xff] }
 0x23e   :  { %v2405_v63 = vcombine.low %v446_v46, %v450_v47  ;;  %v654_v39 = vld [vmem:[#allocation6 + $0x698] sm:$0xff] }
 0x23f   :  { %2216 = vmatpush2.bf16.msra.mxu1 %v2467_v51  ;;  %v2541_v51 = vcombine.low %v582_v40, %v586_v41  ;;  %v658_v40 = vld [vmem:[#allocation6 + $0x6b8] sm:$0xff] }
 0x240   :  { %2257 = vmatpush2.bf16.msra.mxu0 %v2595_v52  ;;  %2267 = vmatprep.subr.bf16.mxu1 %v2462_v53  ;;  %v2406_v52 = vcombine.high %v446_v46, %v450_v47  ;;  %v2534_v53 = vcombine.high %v574_v48, %v578_v49  ;;  %v522_v46 = vld [vmem:[#allocation6 + $0x278] sm:$0xff] }
 0x241   :  { %2308 = vmatprep.subr.bf16.mxu0 %v2590_v54  ;;  %v566_v54 = vld [vmem:[#allocation6 + $0x3d8] sm:$0xff] }
 0x242   :  { %2218 = vmatmul.mubr.bf16.vlgmr.msra.gmra.mxu1 %v2880_v23  ;;  %v2525_v7 = vcombine.low %v566_v54, %v570_v58  ;;  %v646_v47 = vld [vmem:[#allocation6 + $0x658] sm:$0xff] }
 0x243   :  { %2259 = vmatmul.mubr.bf16.vlgmr.msra.gmra.mxu0 %v2882_v24  ;;  %2268 = vmatpush1.bf16.msra.mxu1 %v2461_v62  ;;  %v698_v62 = vld [vmem:[#allocation6 + $0x7f8] sm:$0xff] }
 0x244   :  { %2299 = vmatprep.mubr.bf16.mxu1 %v2876_v21  ;;  %2309 = vmatpush1.bf16.msra.mxu0 %v2589_v1  ;;  %v2566_v21 = vcombine.high %v606_v14, %v610_v15  ;;  %v2526_v1 = vcombine.high %v566_v54, %v570_v58  ;;  %v682_v14 = vld [vmem:[#allocation6 + $0x778] sm:$0xff]  ;;  %v2517_v15 = vcombine.low %v558_v3, %v562_v4 }
 0x245   :  { %2340 = vmatprep.mubr.bf16.mxu0 %v2878_v22  ;;  %2269 = vmatprep.subr.bf16.mxu1 %v2454_v2  ;;  %v2437_v22 = vcombine.low %v478_v12, %v482_v13  ;;  %v2654_v2 = vcombine.high %v694_v61, %v698_v62  ;;  %v554_v12 = vld [vmem:[#allocation6 + $0x378] sm:$0xff] }
 0x246   :  { %2310 = vmatprep.subr.bf16.mxu0 %v2582_v5  ;;  %v686_v5 = vld [vmem:[#allocation6 + $0x798] sm:$0xff] }
 0x247   :  { %2270 = vmatpush1.bf16.msra.mxu1 %v2453_v8  ;;  %v2653_v8 = vcombine.low %v694_v61, %v698_v62  ;;  %v678_v13 = vld [vmem:[#allocation6 + $0x758] sm:$0xff] }
 0x248   :  { %2311 = vmatpush1.bf16.msra.mxu0 %v2581_v9  ;;  %2271 = vmatprep.subr.bf16.mxu1 %v2446_v10  ;;  %v2518_v9 = vcombine.high %v558_v3, %v562_v4  ;;  %v2646_v10 = vcombine.high %v686_v5, %v690_v6  ;;  %v650_v48 = vld [vmem:[#allocation6 + $0x678] sm:$0xff]  ;;  %v699_v4 = vld [vmem:[%s2945_s6] sm:$0xff] }
 0x249   :  { %2312 = vmatprep.subr.bf16.mxu0 %v2574_v11  ;;  %v550_v11 = vld [vmem:[#allocation6 + $0x358] sm:$0xff] }
 0x24a   :  { %v2509_v26 = vcombine.low %v550_v11, %v554_v12  ;;  %v514_v54 = vld [vmem:[#allocation6 + $0x238] sm:$0xff] }
 0x24b   :  { %2272 = vmatpush1.bf16.msra.mxu1 %v2445_v16  ;;  %v2645_v16 = vcombine.low %v686_v5, %v690_v6  ;;  %v638_v58 = vld [vmem:[#allocation6 + $0x618] sm:$0xff]  ;;  %v704_v5 = vrot.slane %v699_v4, %v175_v56  ;;  %v708_v6 = vrot.slane %v699_v4, %v179_v59 }
 0x24c   :  { %2313 = vmatpush1.bf16.msra.mxu0 %v2573_v17  ;;  %2273 = vmatprep.subr.bf16.mxu1 %v2438_v18  ;;  %v2510_v17 = vcombine.high %v550_v11, %v554_v12  ;;  %v2638_v18 = vcombine.high %v678_v13, %v682_v14  ;;  %v642_v61 = vld [vmem:[#allocation6 + $0x638] sm:$0xff] }
 0x24d   :  { %2314 = vmatprep.subr.bf16.mxu0 %v2566_v21  ;;  %v542_v21 = vld [vmem:[#allocation6 + $0x318] sm:$0xff]  ;;  %v2597_v3 = vcombine.low %v638_v58, %v642_v61 }
 0x24e   :  { %v2501_v33 = vcombine.low %v542_v21, %v546_v19 }
 0x24f   :  { %2274 = vmatpush1.bf16.msra.mxu1 %v2437_v22  ;;  %v2637_v22 = vcombine.low %v678_v13, %v682_v14 }
 0x250   :  { %2315 = vmatpush1.bf16.msra.mxu0 %v2565_v27  ;;  %2275 = vmatprep.subr.bf16.mxu1 %v2430_v28  ;;  %v2502_v27 = vcombine.high %v542_v21, %v546_v19  ;;  %v2630_v28 = vcombine.high %v670_v20, %v674_v25 }
 0x251   :  { %2316 = vmatprep.subr.bf16.mxu0 %v2558_v29  ;;  %v534_v29 = vld [vmem:[#allocation6 + $0x2d8] sm:$0xff] }
 0x252   :  { %v2493_v41 = vcombine.low %v534_v29, %v538_v30 }
 0x253   :  { %2276 = vmatpush1.bf16.msra.mxu1 %v2429_v34  ;;  %v2629_v34 = vcombine.low %v670_v20, %v674_v25 }
 0x254   :  { %2317 = vmatpush1.bf16.msra.mxu0 %v2557_v35  ;;  %2277 = vmatprep.subr.bf16.mxu1 %v2422_v36  ;;  %v2494_v35 = vcombine.high %v534_v29, %v538_v30  ;;  %v2622_v36 = vcombine.high %v662_v31, %v666_v32 }
 0x255   :  { %2318 = vmatprep.subr.bf16.mxu0 %v2550_v37  ;;  %v526_v37 = vld [vmem:[#allocation6 + $0x298] sm:$0xff] }
 0x256   :  { %v2485_v49 = vcombine.low %v526_v37, %v530_v38 }
 0x257   :  { %2278 = vmatpush1.bf16.msra.mxu1 %v2421_v42  ;;  %v2621_v42 = vcombine.low %v662_v31, %v666_v32 }
 0x258   :  { %2319 = vmatpush1.bf16.msra.mxu0 %v2549_v43  ;;  %2279 = vmatprep.subr.bf16.mxu1 %v2414_v44  ;;  %v2486_v43 = vcombine.high %v526_v37, %v530_v38  ;;  %v2614_v44 = vcombine.high %v654_v39, %v658_v40 }
 0x259   :  { %2320 = vmatprep.subr.bf16.mxu0 %v2542_v45  ;;  %v518_v45 = vld [vmem:[#allocation6 + $0x258] sm:$0xff] }
 0x25a   :  { %v2477_v62 = vcombine.low %v518_v45, %v522_v46 }
 0x25b   :  { %2280 = vmatpush1.bf16.msra.mxu1 %v2413_v50  ;;  %v2613_v50 = vcombine.low %v654_v39, %v658_v40 }
 0x25c   :  { %2321 = vmatpush1.bf16.msra.mxu0 %v2541_v51  ;;  %2281 = vmatprep.subr.bf16.mxu1 %v2406_v52  ;;  %v2478_v51 = vcombine.high %v518_v45, %v522_v46  ;;  %v2606_v52 = vcombine.high %v646_v47, %v650_v48  ;;  %v727_v45 = vsub.s32 6, %v2859_v55  ;;  %v731_v46 = vsub.s32 7, %v2859_v55 }
 0x25d   :  { %2322 = vmatprep.subr.bf16.mxu0 %v2534_v53  ;;  %v510_v53 = vld [vmem:[#allocation6 + $0x218] sm:$0xff] }
 0x25f   :  { %2282 = vmatpush1.bf16.msra.mxu1 %v2405_v63  ;;  %v2605_v63 = vcombine.low %v646_v47, %v650_v48  ;;  %v728_v47 = vrot.slane %v699_v4, %v727_v45  ;;  %v732_v48 = vrot.slane %v699_v4, %v731_v46 }
 0x260   :  { %2323 = vmatpush1.bf16.msra.mxu0 %v2533_v0  ;;  %2283 = vmatprep.subr.bf16.mxu1 %v2526_v1  ;;  %v2470_v0 = vcombine.high %v510_v53, %v514_v54  ;;  %v2598_v1 = vcombine.high %v638_v58, %v642_v61 }
 0x261   :  { %2324 = vmatprep.subr.bf16.mxu0 %v2654_v2  ;;  %v2469_v2 = vcombine.low %v510_v53, %v514_v54 }
 0x263   :  { %2284 = vmatpush2.bf16.msra.mxu1 %v2525_v7 }
 0x264   :  { %2325 = vmatpush2.bf16.msra.mxu0 %v2653_v8  ;;  %2285 = vmatprep.subr.bf16.mxu1 %v2518_v9 }
 0x265   :  { %2326 = vmatprep.subr.bf16.mxu0 %v2646_v10 }
 0x267   :  { %2286 = vmatpush2.bf16.msra.mxu1 %v2517_v15 }
 0x268   :  { %2327 = vmatpush2.bf16.msra.mxu0 %v2645_v16  ;;  %2287 = vmatprep.subr.bf16.mxu1 %v2510_v17 }
 0x269   :  { %2328 = vmatprep.subr.bf16.mxu0 %v2638_v18 }
 0x26b   :  { %2288 = vmatpush2.bf16.msra.mxu1 %v2509_v26 }
 0x26c   :  { %2329 = vmatpush2.bf16.msra.mxu0 %v2637_v22  ;;  %2289 = vmatprep.subr.bf16.mxu1 %v2502_v27 }
 0x26d   :  { %2330 = vmatprep.subr.bf16.mxu0 %v2630_v28 }
 0x26f   :  { %2290 = vmatpush2.bf16.msra.mxu1 %v2501_v33 }
 0x270   :  { %2331 = vmatpush2.bf16.msra.mxu0 %v2629_v34  ;;  %2291 = vmatprep.subr.bf16.mxu1 %v2494_v35 }
 0x271   :  { %2332 = vmatprep.subr.bf16.mxu0 %v2622_v36 }
 0x273   :  { %2292 = vmatpush2.bf16.msra.mxu1 %v2493_v41 }
 0x274   :  { %2333 = vmatpush2.bf16.msra.mxu0 %v2621_v42  ;;  %2293 = vmatprep.subr.bf16.mxu1 %v2486_v43 }
 0x275   :  { %2334 = vmatprep.subr.bf16.mxu0 %v2614_v44 }
 0x277   :  { %2294 = vmatpush2.bf16.msra.mxu1 %v2485_v49 }
 0x278   :  { %2335 = vmatpush2.bf16.msra.mxu0 %v2613_v50  ;;  %2295 = vmatprep.subr.bf16.mxu1 %v2478_v51 }
 0x279   :  { %2336 = vmatprep.subr.bf16.mxu0 %v2606_v52 }
 0x27b   :  { %2296 = vmatpush2.bf16.msra.mxu1 %v2477_v62 }
 0x27c   :  { %2337 = vmatpush2.bf16.msra.mxu0 %v2605_v63  ;;  %2297 = vmatprep.subr.bf16.mxu1 %v2470_v0 }
 0x27d   :  { %2338 = vmatprep.subr.bf16.mxu0 %v2598_v1 }
 0x27f   :  { %2298 = vmatpush2.bf16.msra.mxu1 %v2469_v2 }
 0x280   :  { %2339 = vmatpush2.bf16.msra.mxu0 %v2597_v3 }
 0x282   :  { %2300 = vmatmul.mubr.bf16.vlgmr.msra.gmra.mxu1 %v2880_v23  ;;  %v2055_v7 = vpop.f32.mrf.mxu1  ;;  %v2096_v8 = vpop.f32.mrf.mxu0  ;;  %v712_v23 = vrot.slane %v699_v4, %v183_v57  ;;  %v719_v57 = vsub.s32 4, %v2859_v55 }
 0x283   :  { %2341 = vmatmul.mubr.bf16.vlgmr.msra.gmra.mxu0 %v2882_v24  ;;  %v2056_v9 = vadd.f32 %v2055_v7, %v704_v5  ;;  %v716_v24 = vrot.slane %v699_v4, %v187_v60  ;;  %v723_v60 = vsub.s32 5, %v2859_v55 }
 0x284   :  { %v2057_v10 = vpop.f32.mrf.mxu1  ;;  %v2098_v11 = vpop.f32.mrf.mxu0  ;;  %v720_v31 = vrot.slane %v699_v4, %v719_v57 }
 0x285   :  { %v2097_v12 = vadd.f32 %v2096_v8, %v2056_v9  ;;  %v2058_v13 = vadd.f32 %v2057_v10, %v708_v6  ;;  %v724_v32 = vrot.slane %v699_v4, %v723_v60 }
 0x286   :  { %v2059_v14 = vpop.f32.mrf.mxu1  ;;  %v2100_v15 = vpop.f32.mrf.mxu0 }
 0x287   :  { %2349 = vst [vmem:[%s2946_s7] sm:$0xff] %v2097_v12  ;;  %v2099_v56 = vadd.f32 %v2098_v11, %v2058_v13 }
 0x288   :  { %v2060_v16 = vpop.f32.mrf.mxu1  ;;  %v2101_v59 = vpop.f32.mrf.mxu0 }
 0x289   :  { %2350 = vst [vmem:[%s2946_s7 + $0x8] sm:$0xff] %v2099_v56 }
 0x2c2   :  { %v2137_v17 = vpop.f32.mrf.mxu1  ;;  %v2178_v18 = vpop.f32.mrf.mxu0 }
 0x2c3   :  { %v2138_v21 = vadd.f32 %v2137_v17, %v712_v23 }
 0x2c4   :  { %v2139_v19 = vpop.f32.mrf.mxu1  ;;  %v2180_v20 = vpop.f32.mrf.mxu0 }
 0x2c5   :  { %v2179_v25 = vadd.f32 %v2178_v18, %v2138_v21  ;;  %v2140_v26 = vadd.f32 %v2139_v19, %v716_v24 }
 0x2c6   :  { %v2141_v22 = vpop.f32.mrf.mxu1  ;;  %v2182_v27 = vpop.f32.mrf.mxu0 }
 0x2c7   :  { %2351 = vst [vmem:[%s2946_s7 + $0x10] sm:$0xff] %v2179_v25  ;;  %v2181_v28 = vadd.f32 %v2180_v20, %v2140_v26 }
 0x2c8   :  { %v2142_v29 = vpop.f32.mrf.mxu1  ;;  %v2183_v30 = vpop.f32.mrf.mxu0 }
 0x2c9   :  { %2352 = vst [vmem:[%s2946_s7 + $0x18] sm:$0xff] %v2181_v28 }
 0x302   :  { %v2219_v33 = vpop.f32.mrf.mxu1 }
 0x303   :  { %v2220_v34 = vadd.f32 %v2219_v33, %v720_v31  ;;  %v2260_v35 = vpop.f32.mrf.mxu0 }
 0x304   :  { %v2221_v36 = vpop.f32.mrf.mxu1 }
 0x305   :  { %v2261_v37 = vadd.f32 %v2260_v35, %v2220_v34  ;;  %v2222_v38 = vadd.f32 %v2221_v36, %v724_v32  ;;  %v2262_v39 = vpop.f32.mrf.mxu0 }
 0x306   :  { %v2223_v40 = vpop.f32.mrf.mxu1 }
 0x307   :  { %2353 = vst [vmem:[%s2946_s7 + $0x20] sm:$0xff] %v2261_v37  ;;  %v2263_v41 = vadd.f32 %v2262_v39, %v2222_v38  ;;  %v2264_v42 = vpop.f32.mrf.mxu0 }
 0x308   :  { %v2224_v43 = vpop.f32.mrf.mxu1 }
 0x309   :  { %2354 = vst [vmem:[%s2946_s7 + $0x28] sm:$0xff] %v2263_v41  ;;  %v2265_v44 = vpop.f32.mrf.mxu0 }
 0x342   :  { %v2301_v49 = vpop.f32.mrf.mxu1 }
 0x343   :  { %v2302_v50 = vadd.f32 %v2301_v49, %v728_v47  ;;  %v2342_v51 = vpop.f32.mrf.mxu0 }
 0x344   :  { %v2303_v52 = vpop.f32.mrf.mxu1 }
 0x345   :  { %v2343_v53 = vadd.f32 %v2342_v51, %v2302_v50  ;;  %v2304_v54 = vadd.f32 %v2303_v52, %v732_v48  ;;  %v2344_v58 = vpop.f32.mrf.mxu0 }
 0x346   :  { %v2305_v61 = vpop.f32.mrf.mxu1 }
 0x347   :  { %2355 = vst [vmem:[%s2946_s7 + $0x30] sm:$0xff] %v2343_v53  ;;  %v2345_v62 = vadd.f32 %v2344_v58, %v2304_v54  ;;  %v2346_v63 = vpop.f32.mrf.mxu0 }
 0x348   :  { %v2306_v0 = vpop.f32.mrf.mxu1 }
 0x349   :  { %2356 = vst [vmem:[%s2946_s7 + $0x38] sm:$0xff] %v2345_v62  ;;  %v2347_v55 = vpop.f32.mrf.mxu0 }
 0x34a   :  { %2361 = vsyncpa [#allocation3], 1 }
 0x34b   :  { %2362 = vsyncpa [#allocation5], 1 }

</bundles_post_ra>
